<compile_context>
chip_gen: v7x
topology: tpu7x:2x2x1
jax: 0.10.0
libtpu: 0.0.40
codegen_flags: <defaults>
</compile_context>

<pallas_src>
import math
from functools import partial

import jax
import jax.numpy as jnp
from jax.experimental import pallas as pl
from jax.experimental.pallas import tpu as pltpu


def _ln(x, gamma, beta, eps=1e-5):
    mean = jnp.mean(x, axis=-1, keepdims=True)
    var = jnp.mean((x - mean) ** 2, axis=-1, keepdims=True)
    return (x - mean) * jax.lax.rsqrt(var + eps) * gamma + beta


# ----------------------------------------------------------------------------
# Fused kernel: all encoder layers, activations resident in VMEM/vregs
# ----------------------------------------------------------------------------
def fused_transformer_kernel(x_ref, wa_ref, w2_ref, b_ref, o_ref, *,
                             nheads, batch, seqlen):
    R, D = x_ref.shape
    hd = D // nheads
    nlayers = wa_ref.shape[0]
    Dff = w2_ref.shape[1]

    h = x_ref[...]                                   # (R, D); pe already added

    for l in range(nlayers):                         # static layer loop
        wa = wa_ref[l]                               # (D, 3D + D + Dff)
        w2 = w2_ref[l]                               # (Dff, D)
        bl = b_ref[l]                                # (8, 128) padded rows

        wqkv = wa[:, :3 * D]                         # Q columns pre-scaled
        wo = wa[:, 3 * D:4 * D]
        w1 = wa[:, 4 * D:4 * D + Dff]

        bqkv = bl[0:1, :3 * D]
        bo = bl[1:2, :D]
        b1 = bl[2:3, :Dff]
        b2 = bl[3:4, :D]
        g1 = bl[4:5, :D]
        be1 = bl[5:6, :D]
        g2 = bl[6:7, :D]
        be2 = bl[7:8, :D]

        # ---- fused QKV projection: one (R,D)@(D,3D) matmul -----------------
        qkv = jnp.dot(h, wqkv, preferred_element_type=jnp.float32) + bqkv

        # ---- multi-head self-attention (static batch & head loops) ---------
        batch_out = []
        for b in range(batch):
            r0 = b * seqlen                          # sublane-aligned row base
            qkv_b = qkv[r0:r0 + seqlen, :]
            head_cols = []
            for hh in range(nheads):
                c = hh * hd
                q_bh = qkv_b[:, c:c + hd]
                k_bh = qkv_b[:, D + c:D + c + hd]
                v_bh = qkv_b[:, 2 * D + c:2 * D + c + hd]
                s = jax.lax.dot_general(q_bh, k_bh, (((1,), (1,)), ((), ())),
                                        preferred_element_type=jnp.float32)
                s = s - jnp.max(s, axis=-1, keepdims=True)
                p = jnp.exp(s)
                p = p * pl.reciprocal(jnp.sum(p, axis=-1, keepdims=True),
                                      approx=False)
                head_cols.append(jnp.dot(p, v_bh,
                                         preferred_element_type=jnp.float32))
            batch_out.append(jnp.concatenate(head_cols, axis=-1))   # (L, D)
        attn = jnp.concatenate(batch_out, axis=0)                   # (R, D)
        # ---- single output projection: (R,D)@(D,D) -------------------------
        attn = jnp.dot(attn, wo, preferred_element_type=jnp.float32) + bo

        # ---- residual + post-LN 1 (norm_first=False) ------------------------
        h = _ln(h + attn, g1, be1)

        # ---- FFN: Linear(D->Dff) -> ReLU -> Linear(Dff->D) ------------------
        ff = jnp.maximum(
            jnp.dot(h, w1, preferred_element_type=jnp.float32) + b1, 0.0)
        ff = jnp.dot(ff, w2, preferred_element_type=jnp.float32) + b2

        # ---- residual + post-LN 2 -------------------------------------------
        h = _ln(h + ff, g2, be2)

    o_ref[...] = h                                    # full (R, D); select outside


def transformer_block_forward(x, pe, packed, nheads):
    """x: (B, L, D) -> (B, D)   (matches TransformerBlock.forward, eval mode)."""
    B, L, D = x.shape
    R = B * L
    wa, w2s, bs = packed

    # Positional encoding add + flatten in the wrapper (free XLA metadata).
    # Dropouts (pos-encoder + in-layer) are identity in eval mode.
    x2d = (x + pe[None, :, :]).reshape(R, D)

    def full_spec(arr):
        nd = arr.ndim
        return pl.BlockSpec(arr.shape, lambda i, _nd=nd: (0,) * _nd)

    h = pl.pallas_call(
        partial(fused_transformer_kernel, nheads=nheads, batch=B, seqlen=L),
        out_shape=jax.ShapeDtypeStruct((R, D), jnp.float32),
        grid=(1,),
        in_specs=[full_spec(x2d), full_spec(wa), full_spec(w2s), full_spec(bs)],
        out_specs=pl.BlockSpec((R, D), lambda i: (0, 0)),
        compiler_params=pltpu.CompilerParams(
            dimension_semantics=("arbitrary",)),
    )(x2d, wa, w2s, bs)

    # last sequence position of the final layer -> (B, D)
    return h.reshape(B, L, D)[:, -1, :]


# ----------------------------------------------------------------------------
# Params: positional encoding, PyTorch-layout init, lane-dense slab packing
# ----------------------------------------------------------------------------
def positional_encoding(max_len, d_model):
    position = jnp.arange(max_len, dtype=jnp.float32)[:, None]
    div_term = jnp.exp(jnp.arange(0, d_model, 2, dtype=jnp.float32)
                       * (-math.log(10000.0) / d_model))
    pe = jnp.zeros((max_len, d_model), jnp.float32)
    pe = pe.at[:, 0::2].set(jnp.sin(position * div_term))
    pe = pe.at[:, 1::2].set(jnp.cos(position * div_term))
    return pe                                                        # (L, D)


def init_layer_params(key, D, Dff):
    ks = jax.random.split(key, 8)
    s = 0.05
    return dict(
        # weights stored already transposed: (in_features, out_features)
        wqkv=jax.random.normal(ks[0], (D, 3 * D), jnp.float32) * s,
        bqkv=jax.random.normal(ks[1], (1, 3 * D), jnp.float32) * s,
        wo=jax.random.normal(ks[2], (D, D), jnp.float32) * s,
        bo=jax.random.normal(ks[3], (1, D), jnp.float32) * s,
        g1=jnp.ones((1, D), jnp.float32),
        be1=jnp.zeros((1, D), jnp.float32),
        w1=jax.random.normal(ks[4], (D, Dff), jnp.float32) * s,
        b1=jax.random.normal(ks[5], (1, Dff), jnp.float32) * s,
        w2=jax.random.normal(ks[6], (Dff, D), jnp.float32) * s,
        b2=jax.random.normal(ks[7], (1, D), jnp.float32) * s,
        g2=jnp.ones((1, D), jnp.float32),
        be2=jnp.zeros((1, D), jnp.float32),
    )


def pack_kernel_params(math_layers, nheads):
    """Pack per-layer params into 3 stacked lane-dense slabs.
    1/sqrt(hd) is folded into the Q columns of the fused QKV weight/bias."""
    D = math_layers[0]["wo"].shape[0]
    Dff = math_layers[0]["w1"].shape[1]
    hd = D // nheads
    scale = 1.0 / math.sqrt(hd)
    bw = max(128, -(-3 * D // 128) * 128)            # bias-row lane width

    def pad_row(v):
        return jnp.pad(v, ((0, 0), (0, bw - v.shape[1])))

    wa_l, w2_l, b_l = [], [], []
    for p in math_layers:
        wqkv = jnp.concatenate([p["wqkv"][:, :D] * scale, p["wqkv"][:, D:]], 1)
        bqkv = jnp.concatenate([p["bqkv"][:, :D] * scale, p["bqkv"][:, D:]], 1)
        wa_l.append(jnp.concatenate([wqkv, p["wo"], p["w1"]], axis=1))
        w2_l.append(p["w2"])
        b_l.append(jnp.concatenate(
            [pad_row(bqkv), pad_row(p["bo"]), pad_row(p["b1"]),
             pad_row(p["b2"]), pad_row(p["g1"]), pad_row(p["be1"]),
             pad_row(p["g2"]), pad_row(p["be2"])], axis=0))
    return jnp.stack(wa_l), jnp.stack(w2_l), jnp.stack(b_l)


# ----------------------------------------------------------------------------
# Pure-JAX reference (mirrors the PyTorch module, eval mode)
# ----------------------------------------------------------------------------
def reference_forward(x, pe, layers, nheads):
    B, L, D = x.shape
    hd = D // nheads
    h = x + pe[None, :, :]
    for p in layers:
        qkv = h @ p["wqkv"] + p["bqkv"]
        q = qkv[..., :D].reshape(B, L, nheads, hd)
        k = qkv[..., D:2 * D].reshape(B, L, nheads, hd)
        v = qkv[..., 2 * D:].reshape(B, L, nheads, hd)
        s = jnp.einsum("bqhd,bkhd->bhqk", q, k) / math.sqrt(hd)
        a = jax.nn.softmax(s, axis=-1)
        attn = jnp.einsum("bhqk,bkhd->bqhd", a, v).reshape(B, L, D)
        attn = attn @ p["wo"] + p["bo"]
        h = _ln(h + attn, p["g1"], p["be1"])
        ff = jnp.maximum(h @ p["w1"] + p["b1"], 0.0) @ p["w2"] + p["b2"]
        h = _ln(h + ff, p["g2"], p["be2"])
    return h[:, -1, :]


if __name__ == "__main__":
    # small config: hour_len=8, hidden_dim=32, nheads=4, num_encoder_layers=2
    B, L, D, H, NL = 2, 8, 32, 4, 2
    Dff = 2 * D

    key = jax.random.PRNGKey(0)
    kx, *kl = jax.random.split(key, NL + 1)
    x = jax.random.normal(kx, (B, L, D), jnp.float32)
    pe = positional_encoding(L, D)

    math_layers = [init_layer_params(k, D, Dff) for k in kl]
    packed = pack_kernel_params(math_layers, H)

    out = transformer_block_forward(x, pe, packed, H)
    out = jax.block_until_ready(out)
    assert out.shape == (B, D)

    ref = reference_forward(x, pe, math_layers, H)
    err = float(jnp.max(jnp.abs(out - ref)))
    assert jnp.allclose(out, ref, atol=2e-2, rtol=2e-2), err

    # TODO(synk): dropout (pos-encoder + encoder-layer) is identity here
    # (eval/inference mode), matching the PyTorch module under model.eval().
    print("KERNEL_OK")
</pallas_src>

<mosaic_0001>
module attributes {stable_mosaic.version = 11 : i64} {
  func.func @fused_transformer_kernel(%arg0: i32, %arg1: memref<16x32xf32, #tpu.memory_space<vmem>>, %arg2: memref<2x32x192xf32, #tpu.memory_space<vmem>>, %arg3: memref<2x64x32xf32, #tpu.memory_space<vmem>>, %arg4: memref<2x8x128xf32, #tpu.memory_space<vmem>>, %arg5: memref<16x32xf32, #tpu.memory_space<vmem>>) attributes {dimension_semantics = [#tpu.dimension_semantics<arbitrary>], iteration_bounds = array<i64: 1>, scalar_prefetch = 0 : i64, scratch_operands = 0 : i64, tpu.core_type = #tpu.core_type<tc>, window_params = [{pipeline_mode = #tpu.pipeline_mode<synchronous>, transform_indices = @transform_0, window_bounds = array<i64: 16, 32>}, {pipeline_mode = #tpu.pipeline_mode<synchronous>, transform_indices = @transform_1, window_bounds = array<i64: 2, 32, 192>}, {pipeline_mode = #tpu.pipeline_mode<synchronous>, transform_indices = @transform_2, window_bounds = array<i64: 2, 64, 32>}, {pipeline_mode = #tpu.pipeline_mode<synchronous>, transform_indices = @transform_3, window_bounds = array<i64: 2, 8, 128>}, {pipeline_mode = #tpu.pipeline_mode<synchronous>, transform_indices = @transform_4, window_bounds = array<i64: 16, 32>}]} {
    %c0 = arith.constant 0 : index
    %c0_0 = arith.constant 0 : index
    %0 = vector.load %arg1[%c0, %c0_0] : memref<16x32xf32, #tpu.memory_space<vmem>>, vector<16x32xf32>
    %c0_1 = arith.constant 0 : index
    %c0_2 = arith.constant 0 : index
    %c0_3 = arith.constant 0 : index
    %1 = vector.load %arg2[%c0_1, %c0_2, %c0_3] : memref<2x32x192xf32, #tpu.memory_space<vmem>>, vector<1x32x192xf32>
    %2 = vector.shape_cast %1 : vector<1x32x192xf32> to vector<32x192xf32>
    %c0_4 = arith.constant 0 : index
    %c0_5 = arith.constant 0 : index
    %c0_6 = arith.constant 0 : index
    %3 = vector.load %arg3[%c0_4, %c0_5, %c0_6] : memref<2x64x32xf32, #tpu.memory_space<vmem>>, vector<1x64x32xf32>
    %4 = vector.shape_cast %3 : vector<1x64x32xf32> to vector<64x32xf32>
    %c0_7 = arith.constant 0 : index
    %c0_8 = arith.constant 0 : index
    %c0_9 = arith.constant 0 : index
    %5 = vector.load %arg4[%c0_7, %c0_8, %c0_9] : memref<2x8x128xf32, #tpu.memory_space<vmem>>, vector<1x8x128xf32>
    %6 = vector.shape_cast %5 : vector<1x8x128xf32> to vector<8x128xf32>
    %7 = vector.extract_strided_slice %2 {offsets = [0, 0], sizes = [32, 96], strides = [1, 1]} : vector<32x192xf32> to vector<32x96xf32>
    %8 = vector.extract_strided_slice %2 {offsets = [0, 96], sizes = [32, 32], strides = [1, 1]} : vector<32x192xf32> to vector<32x32xf32>
    %9 = vector.extract_strided_slice %2 {offsets = [0, 128], sizes = [32, 64], strides = [1, 1]} : vector<32x192xf32> to vector<32x64xf32>
    %10 = vector.extract_strided_slice %6 {offsets = [0, 0], sizes = [1, 96], strides = [1, 1]} : vector<8x128xf32> to vector<1x96xf32>
    %11 = vector.extract_strided_slice %6 {offsets = [1, 0], sizes = [1, 32], strides = [1, 1]} : vector<8x128xf32> to vector<1x32xf32>
    %12 = vector.extract_strided_slice %6 {offsets = [2, 0], sizes = [1, 64], strides = [1, 1]} : vector<8x128xf32> to vector<1x64xf32>
    %13 = vector.extract_strided_slice %6 {offsets = [3, 0], sizes = [1, 32], strides = [1, 1]} : vector<8x128xf32> to vector<1x32xf32>
    %14 = vector.extract_strided_slice %6 {offsets = [4, 0], sizes = [1, 32], strides = [1, 1]} : vector<8x128xf32> to vector<1x32xf32>
    %15 = vector.extract_strided_slice %6 {offsets = [5, 0], sizes = [1, 32], strides = [1, 1]} : vector<8x128xf32> to vector<1x32xf32>
    %16 = vector.extract_strided_slice %6 {offsets = [6, 0], sizes = [1, 32], strides = [1, 1]} : vector<8x128xf32> to vector<1x32xf32>
    %17 = vector.extract_strided_slice %6 {offsets = [7, 0], sizes = [1, 32], strides = [1, 1]} : vector<8x128xf32> to vector<1x32xf32>
    %cst = arith.constant dense<0.000000e+00> : vector<16x96xf32>
    %18 = tpu.matmul %0, %7, %cst {dimension_numbers = #tpu.dot_dimension_numbers<[1], [0], [0], [1], [0, 0, 1, 1], [], []>} : vector<16x32xf32>, vector<32x96xf32>, vector<16x96xf32> -> vector<16x96xf32>
    %19 = vector.broadcast %10 : vector<1x96xf32> to vector<16x96xf32>
    %20 = arith.addf %18, %19 : vector<16x96xf32>
    %21 = vector.extract_strided_slice %20 {offsets = [0, 0], sizes = [8, 96], strides = [1, 1]} : vector<16x96xf32> to vector<8x96xf32>
    %22 = vector.extract_strided_slice %21 {offsets = [0, 0], sizes = [8, 8], strides = [1, 1]} : vector<8x96xf32> to vector<8x8xf32>
    %23 = vector.extract_strided_slice %21 {offsets = [0, 32], sizes = [8, 8], strides = [1, 1]} : vector<8x96xf32> to vector<8x8xf32>
    %24 = vector.extract_strided_slice %21 {offsets = [0, 64], sizes = [8, 8], strides = [1, 1]} : vector<8x96xf32> to vector<8x8xf32>
    %cst_10 = arith.constant dense<0.000000e+00> : vector<8x8xf32>
    %25 = tpu.matmul %22, %23, %cst_10 {dimension_numbers = #tpu.dot_dimension_numbers<[1], [1], [0], [0], [0, 0, 1, 0], [], []>} : vector<8x8xf32>, vector<8x8xf32>, vector<8x8xf32> -> vector<8x8xf32>
    %cst_11 = arith.constant dense<0xFF800000> : vector<8xf32>
    %26 = vector.multi_reduction <maximumf>, %25, %cst_11 [1] : vector<8x8xf32> to vector<8xf32>
    %27 = vector.shape_cast %26 : vector<8xf32> to vector<8x1xf32>
    %28 = vector.broadcast %27 : vector<8x1xf32> to vector<8x8xf32>
    %29 = arith.subf %25, %28 : vector<8x8xf32>
    %30 = math.exp %29 : vector<8x8xf32>
    %cst_12 = arith.constant dense<0.000000e+00> : vector<8xf32>
    %31 = vector.multi_reduction <add>, %30, %cst_12 [1] : vector<8x8xf32> to vector<8xf32>
    %32 = vector.shape_cast %31 : vector<8xf32> to vector<8x1xf32>
    %33 = tpu.reciprocal %32 : vector<8x1xf32> -> vector<8x1xf32>
    %34 = vector.broadcast %33 : vector<8x1xf32> to vector<8x8xf32>
    %35 = arith.mulf %30, %34 : vector<8x8xf32>
    %cst_13 = arith.constant dense<0.000000e+00> : vector<8x8xf32>
    %36 = tpu.matmul %35, %24, %cst_13 {dimension_numbers = #tpu.dot_dimension_numbers<[1], [0], [0], [1], [0, 0, 1, 1], [], []>} : vector<8x8xf32>, vector<8x8xf32>, vector<8x8xf32> -> vector<8x8xf32>
    %37 = vector.extract_strided_slice %21 {offsets = [0, 8], sizes = [8, 8], strides = [1, 1]} : vector<8x96xf32> to vector<8x8xf32>
    %38 = vector.extract_strided_slice %21 {offsets = [0, 40], sizes = [8, 8], strides = [1, 1]} : vector<8x96xf32> to vector<8x8xf32>
    %39 = vector.extract_strided_slice %21 {offsets = [0, 72], sizes = [8, 8], strides = [1, 1]} : vector<8x96xf32> to vector<8x8xf32>
    %cst_14 = arith.constant dense<0.000000e+00> : vector<8x8xf32>
    %40 = tpu.matmul %37, %38, %cst_14 {dimension_numbers = #tpu.dot_dimension_numbers<[1], [1], [0], [0], [0, 0, 1, 0], [], []>} : vector<8x8xf32>, vector<8x8xf32>, vector<8x8xf32> -> vector<8x8xf32>
    %cst_15 = arith.constant dense<0xFF800000> : vector<8xf32>
    %41 = vector.multi_reduction <maximumf>, %40, %cst_15 [1] : vector<8x8xf32> to vector<8xf32>
    %42 = vector.shape_cast %41 : vector<8xf32> to vector<8x1xf32>
    %43 = vector.broadcast %42 : vector<8x1xf32> to vector<8x8xf32>
    %44 = arith.subf %40, %43 : vector<8x8xf32>
    %45 = math.exp %44 : vector<8x8xf32>
    %cst_16 = arith.constant dense<0.000000e+00> : vector<8xf32>
    %46 = vector.multi_reduction <add>, %45, %cst_16 [1] : vector<8x8xf32> to vector<8xf32>
    %47 = vector.shape_cast %46 : vector<8xf32> to vector<8x1xf32>
    %48 = tpu.reciprocal %47 : vector<8x1xf32> -> vector<8x1xf32>
    %49 = vector.broadcast %48 : vector<8x1xf32> to vector<8x8xf32>
    %50 = arith.mulf %45, %49 : vector<8x8xf32>
    %cst_17 = arith.constant dense<0.000000e+00> : vector<8x8xf32>
    %51 = tpu.matmul %50, %39, %cst_17 {dimension_numbers = #tpu.dot_dimension_numbers<[1], [0], [0], [1], [0, 0, 1, 1], [], []>} : vector<8x8xf32>, vector<8x8xf32>, vector<8x8xf32> -> vector<8x8xf32>
    %52 = vector.extract_strided_slice %21 {offsets = [0, 16], sizes = [8, 8], strides = [1, 1]} : vector<8x96xf32> to vector<8x8xf32>
    %53 = vector.extract_strided_slice %21 {offsets = [0, 48], sizes = [8, 8], strides = [1, 1]} : vector<8x96xf32> to vector<8x8xf32>
    %54 = vector.extract_strided_slice %21 {offsets = [0, 80], sizes = [8, 8], strides = [1, 1]} : vector<8x96xf32> to vector<8x8xf32>
    %cst_18 = arith.constant dense<0.000000e+00> : vector<8x8xf32>
    %55 = tpu.matmul %52, %53, %cst_18 {dimension_numbers = #tpu.dot_dimension_numbers<[1], [1], [0], [0], [0, 0, 1, 0], [], []>} : vector<8x8xf32>, vector<8x8xf32>, vector<8x8xf32> -> vector<8x8xf32>
    %cst_19 = arith.constant dense<0xFF800000> : vector<8xf32>
    %56 = vector.multi_reduction <maximumf>, %55, %cst_19 [1] : vector<8x8xf32> to vector<8xf32>
    %57 = vector.shape_cast %56 : vector<8xf32> to vector<8x1xf32>
    %58 = vector.broadcast %57 : vector<8x1xf32> to vector<8x8xf32>
    %59 = arith.subf %55, %58 : vector<8x8xf32>
    %60 = math.exp %59 : vector<8x8xf32>
    %cst_20 = arith.constant dense<0.000000e+00> : vector<8xf32>
    %61 = vector.multi_reduction <add>, %60, %cst_20 [1] : vector<8x8xf32> to vector<8xf32>
    %62 = vector.shape_cast %61 : vector<8xf32> to vector<8x1xf32>
    %63 = tpu.reciprocal %62 : vector<8x1xf32> -> vector<8x1xf32>
    %64 = vector.broadcast %63 : vector<8x1xf32> to vector<8x8xf32>
    %65 = arith.mulf %60, %64 : vector<8x8xf32>
    %cst_21 = arith.constant dense<0.000000e+00> : vector<8x8xf32>
    %66 = tpu.matmul %65, %54, %cst_21 {dimension_numbers = #tpu.dot_dimension_numbers<[1], [0], [0], [1], [0, 0, 1, 1], [], []>} : vector<8x8xf32>, vector<8x8xf32>, vector<8x8xf32> -> vector<8x8xf32>
    %67 = vector.extract_strided_slice %21 {offsets = [0, 24], sizes = [8, 8], strides = [1, 1]} : vector<8x96xf32> to vector<8x8xf32>
    %68 = vector.extract_strided_slice %21 {offsets = [0, 56], sizes = [8, 8], strides = [1, 1]} : vector<8x96xf32> to vector<8x8xf32>
    %69 = vector.extract_strided_slice %21 {offsets = [0, 88], sizes = [8, 8], strides = [1, 1]} : vector<8x96xf32> to vector<8x8xf32>
    %cst_22 = arith.constant dense<0.000000e+00> : vector<8x8xf32>
    %70 = tpu.matmul %67, %68, %cst_22 {dimension_numbers = #tpu.dot_dimension_numbers<[1], [1], [0], [0], [0, 0, 1, 0], [], []>} : vector<8x8xf32>, vector<8x8xf32>, vector<8x8xf32> -> vector<8x8xf32>
    %cst_23 = arith.constant dense<0xFF800000> : vector<8xf32>
    %71 = vector.multi_reduction <maximumf>, %70, %cst_23 [1] : vector<8x8xf32> to vector<8xf32>
    %72 = vector.shape_cast %71 : vector<8xf32> to vector<8x1xf32>
    %73 = vector.broadcast %72 : vector<8x1xf32> to vector<8x8xf32>
    %74 = arith.subf %70, %73 : vector<8x8xf32>
    %75 = math.exp %74 : vector<8x8xf32>
    %cst_24 = arith.constant dense<0.000000e+00> : vector<8xf32>
    %76 = vector.multi_reduction <add>, %75, %cst_24 [1] : vector<8x8xf32> to vector<8xf32>
    %77 = vector.shape_cast %76 : vector<8xf32> to vector<8x1xf32>
    %78 = tpu.reciprocal %77 : vector<8x1xf32> -> vector<8x1xf32>
    %79 = vector.broadcast %78 : vector<8x1xf32> to vector<8x8xf32>
    %80 = arith.mulf %75, %79 : vector<8x8xf32>
    %cst_25 = arith.constant dense<0.000000e+00> : vector<8x8xf32>
    %81 = tpu.matmul %80, %69, %cst_25 {dimension_numbers = #tpu.dot_dimension_numbers<[1], [0], [0], [1], [0, 0, 1, 1], [], []>} : vector<8x8xf32>, vector<8x8xf32>, vector<8x8xf32> -> vector<8x8xf32>
    %82 = tpu.concatenate %36, %51, %66, %81 in 1 : vector<8x8xf32>, vector<8x8xf32>, vector<8x8xf32>, vector<8x8xf32> -> vector<8x32xf32>
    %83 = vector.extract_strided_slice %20 {offsets = [8, 0], sizes = [8, 96], strides = [1, 1]} : vector<16x96xf32> to vector<8x96xf32>
    %84 = vector.extract_strided_slice %83 {offsets = [0, 0], sizes = [8, 8], strides = [1, 1]} : vector<8x96xf32> to vector<8x8xf32>
    %85 = vector.extract_strided_slice %83 {offsets = [0, 32], sizes = [8, 8], strides = [1, 1]} : vector<8x96xf32> to vector<8x8xf32>
    %86 = vector.extract_strided_slice %83 {offsets = [0, 64], sizes = [8, 8], strides = [1, 1]} : vector<8x96xf32> to vector<8x8xf32>
    %cst_26 = arith.constant dense<0.000000e+00> : vector<8x8xf32>
    %87 = tpu.matmul %84, %85, %cst_26 {dimension_numbers = #tpu.dot_dimension_numbers<[1], [1], [0], [0], [0, 0, 1, 0], [], []>} : vector<8x8xf32>, vector<8x8xf32>, vector<8x8xf32> -> vector<8x8xf32>
    %cst_27 = arith.constant dense<0xFF800000> : vector<8xf32>
    %88 = vector.multi_reduction <maximumf>, %87, %cst_27 [1] : vector<8x8xf32> to vector<8xf32>
    %89 = vector.shape_cast %88 : vector<8xf32> to vector<8x1xf32>
    %90 = vector.broadcast %89 : vector<8x1xf32> to vector<8x8xf32>
    %91 = arith.subf %87, %90 : vector<8x8xf32>
    %92 = math.exp %91 : vector<8x8xf32>
    %cst_28 = arith.constant dense<0.000000e+00> : vector<8xf32>
    %93 = vector.multi_reduction <add>, %92, %cst_28 [1] : vector<8x8xf32> to vector<8xf32>
    %94 = vector.shape_cast %93 : vector<8xf32> to vector<8x1xf32>
    %95 = tpu.reciprocal %94 : vector<8x1xf32> -> vector<8x1xf32>
    %96 = vector.broadcast %95 : vector<8x1xf32> to vector<8x8xf32>
    %97 = arith.mulf %92, %96 : vector<8x8xf32>
    %cst_29 = arith.constant dense<0.000000e+00> : vector<8x8xf32>
    %98 = tpu.matmul %97, %86, %cst_29 {dimension_numbers = #tpu.dot_dimension_numbers<[1], [0], [0], [1], [0, 0, 1, 1], [], []>} : vector<8x8xf32>, vector<8x8xf32>, vector<8x8xf32> -> vector<8x8xf32>
    %99 = vector.extract_strided_slice %83 {offsets = [0, 8], sizes = [8, 8], strides = [1, 1]} : vector<8x96xf32> to vector<8x8xf32>
    %100 = vector.extract_strided_slice %83 {offsets = [0, 40], sizes = [8, 8], strides = [1, 1]} : vector<8x96xf32> to vector<8x8xf32>
    %101 = vector.extract_strided_slice %83 {offsets = [0, 72], sizes = [8, 8], strides = [1, 1]} : vector<8x96xf32> to vector<8x8xf32>
    %cst_30 = arith.constant dense<0.000000e+00> : vector<8x8xf32>
    %102 = tpu.matmul %99, %100, %cst_30 {dimension_numbers = #tpu.dot_dimension_numbers<[1], [1], [0], [0], [0, 0, 1, 0], [], []>} : vector<8x8xf32>, vector<8x8xf32>, vector<8x8xf32> -> vector<8x8xf32>
    %cst_31 = arith.constant dense<0xFF800000> : vector<8xf32>
    %103 = vector.multi_reduction <maximumf>, %102, %cst_31 [1] : vector<8x8xf32> to vector<8xf32>
    %104 = vector.shape_cast %103 : vector<8xf32> to vector<8x1xf32>
    %105 = vector.broadcast %104 : vector<8x1xf32> to vector<8x8xf32>
    %106 = arith.subf %102, %105 : vector<8x8xf32>
    %107 = math.exp %106 : vector<8x8xf32>
    %cst_32 = arith.constant dense<0.000000e+00> : vector<8xf32>
    %108 = vector.multi_reduction <add>, %107, %cst_32 [1] : vector<8x8xf32> to vector<8xf32>
    %109 = vector.shape_cast %108 : vector<8xf32> to vector<8x1xf32>
    %110 = tpu.reciprocal %109 : vector<8x1xf32> -> vector<8x1xf32>
    %111 = vector.broadcast %110 : vector<8x1xf32> to vector<8x8xf32>
    %112 = arith.mulf %107, %111 : vector<8x8xf32>
    %cst_33 = arith.constant dense<0.000000e+00> : vector<8x8xf32>
    %113 = tpu.matmul %112, %101, %cst_33 {dimension_numbers = #tpu.dot_dimension_numbers<[1], [0], [0], [1], [0, 0, 1, 1], [], []>} : vector<8x8xf32>, vector<8x8xf32>, vector<8x8xf32> -> vector<8x8xf32>
    %114 = vector.extract_strided_slice %83 {offsets = [0, 16], sizes = [8, 8], strides = [1, 1]} : vector<8x96xf32> to vector<8x8xf32>
    %115 = vector.extract_strided_slice %83 {offsets = [0, 48], sizes = [8, 8], strides = [1, 1]} : vector<8x96xf32> to vector<8x8xf32>
    %116 = vector.extract_strided_slice %83 {offsets = [0, 80], sizes = [8, 8], strides = [1, 1]} : vector<8x96xf32> to vector<8x8xf32>
    %cst_34 = arith.constant dense<0.000000e+00> : vector<8x8xf32>
    %117 = tpu.matmul %114, %115, %cst_34 {dimension_numbers = #tpu.dot_dimension_numbers<[1], [1], [0], [0], [0, 0, 1, 0], [], []>} : vector<8x8xf32>, vector<8x8xf32>, vector<8x8xf32> -> vector<8x8xf32>
    %cst_35 = arith.constant dense<0xFF800000> : vector<8xf32>
    %118 = vector.multi_reduction <maximumf>, %117, %cst_35 [1] : vector<8x8xf32> to vector<8xf32>
    %119 = vector.shape_cast %118 : vector<8xf32> to vector<8x1xf32>
    %120 = vector.broadcast %119 : vector<8x1xf32> to vector<8x8xf32>
    %121 = arith.subf %117, %120 : vector<8x8xf32>
    %122 = math.exp %121 : vector<8x8xf32>
    %cst_36 = arith.constant dense<0.000000e+00> : vector<8xf32>
    %123 = vector.multi_reduction <add>, %122, %cst_36 [1] : vector<8x8xf32> to vector<8xf32>
    %124 = vector.shape_cast %123 : vector<8xf32> to vector<8x1xf32>
    %125 = tpu.reciprocal %124 : vector<8x1xf32> -> vector<8x1xf32>
    %126 = vector.broadcast %125 : vector<8x1xf32> to vector<8x8xf32>
    %127 = arith.mulf %122, %126 : vector<8x8xf32>
    %cst_37 = arith.constant dense<0.000000e+00> : vector<8x8xf32>
    %128 = tpu.matmul %127, %116, %cst_37 {dimension_numbers = #tpu.dot_dimension_numbers<[1], [0], [0], [1], [0, 0, 1, 1], [], []>} : vector<8x8xf32>, vector<8x8xf32>, vector<8x8xf32> -> vector<8x8xf32>
    %129 = vector.extract_strided_slice %83 {offsets = [0, 24], sizes = [8, 8], strides = [1, 1]} : vector<8x96xf32> to vector<8x8xf32>
    %130 = vector.extract_strided_slice %83 {offsets = [0, 56], sizes = [8, 8], strides = [1, 1]} : vector<8x96xf32> to vector<8x8xf32>
    %131 = vector.extract_strided_slice %83 {offsets = [0, 88], sizes = [8, 8], strides = [1, 1]} : vector<8x96xf32> to vector<8x8xf32>
    %cst_38 = arith.constant dense<0.000000e+00> : vector<8x8xf32>
    %132 = tpu.matmul %129, %130, %cst_38 {dimension_numbers = #tpu.dot_dimension_numbers<[1], [1], [0], [0], [0, 0, 1, 0], [], []>} : vector<8x8xf32>, vector<8x8xf32>, vector<8x8xf32> -> vector<8x8xf32>
    %cst_39 = arith.constant dense<0xFF800000> : vector<8xf32>
    %133 = vector.multi_reduction <maximumf>, %132, %cst_39 [1] : vector<8x8xf32> to vector<8xf32>
    %134 = vector.shape_cast %133 : vector<8xf32> to vector<8x1xf32>
    %135 = vector.broadcast %134 : vector<8x1xf32> to vector<8x8xf32>
    %136 = arith.subf %132, %135 : vector<8x8xf32>
    %137 = math.exp %136 : vector<8x8xf32>
    %cst_40 = arith.constant dense<0.000000e+00> : vector<8xf32>
    %138 = vector.multi_reduction <add>, %137, %cst_40 [1] : vector<8x8xf32> to vector<8xf32>
    %139 = vector.shape_cast %138 : vector<8xf32> to vector<8x1xf32>
    %140 = tpu.reciprocal %139 : vector<8x1xf32> -> vector<8x1xf32>
    %141 = vector.broadcast %140 : vector<8x1xf32> to vector<8x8xf32>
    %142 = arith.mulf %137, %141 : vector<8x8xf32>
    %cst_41 = arith.constant dense<0.000000e+00> : vector<8x8xf32>
    %143 = tpu.matmul %142, %131, %cst_41 {dimension_numbers = #tpu.dot_dimension_numbers<[1], [0], [0], [1], [0, 0, 1, 1], [], []>} : vector<8x8xf32>, vector<8x8xf32>, vector<8x8xf32> -> vector<8x8xf32>
    %144 = tpu.concatenate %98, %113, %128, %143 in 1 : vector<8x8xf32>, vector<8x8xf32>, vector<8x8xf32>, vector<8x8xf32> -> vector<8x32xf32>
    %145 = tpu.concatenate %82, %144 in 0 : vector<8x32xf32>, vector<8x32xf32> -> vector<16x32xf32>
    %cst_42 = arith.constant dense<0.000000e+00> : vector<16x32xf32>
    %146 = tpu.matmul %145, %8, %cst_42 {dimension_numbers = #tpu.dot_dimension_numbers<[1], [0], [0], [1], [0, 0, 1, 1], [], []>} : vector<16x32xf32>, vector<32x32xf32>, vector<16x32xf32> -> vector<16x32xf32>
    %147 = vector.broadcast %11 : vector<1x32xf32> to vector<16x32xf32>
    %148 = arith.addf %146, %147 : vector<16x32xf32>
    %149 = arith.addf %0, %148 : vector<16x32xf32>
    %cst_43 = arith.constant dense<0.000000e+00> : vector<16xf32>
    %150 = vector.multi_reduction <add>, %149, %cst_43 [1] : vector<16x32xf32> to vector<16xf32>
    %151 = vector.shape_cast %150 : vector<16xf32> to vector<16x1xf32>
    %cst_44 = arith.constant 3.200000e+01 : f32
    %152 = vector.broadcast %cst_44 : f32 to vector<16x1xf32>
    %153 = arith.divf %151, %152 : vector<16x1xf32>
    %154 = vector.broadcast %153 : vector<16x1xf32> to vector<16x32xf32>
    %155 = arith.subf %149, %154 : vector<16x32xf32>
    %156 = arith.mulf %155, %155 : vector<16x32xf32>
    %cst_45 = arith.constant dense<0.000000e+00> : vector<16xf32>
    %157 = vector.multi_reduction <add>, %156, %cst_45 [1] : vector<16x32xf32> to vector<16xf32>
    %158 = vector.shape_cast %157 : vector<16xf32> to vector<16x1xf32>
    %cst_46 = arith.constant 3.200000e+01 : f32
    %159 = vector.broadcast %cst_46 : f32 to vector<16x1xf32>
    %160 = arith.divf %158, %159 : vector<16x1xf32>
    %161 = vector.broadcast %153 : vector<16x1xf32> to vector<16x32xf32>
    %162 = arith.subf %149, %161 : vector<16x32xf32>
    %cst_47 = arith.constant 9.99999974E-6 : f32
    %163 = vector.broadcast %cst_47 : f32 to vector<16x1xf32>
    %164 = arith.addf %160, %163 : vector<16x1xf32>
    %165 = math.rsqrt %164 : vector<16x1xf32>
    %166 = vector.broadcast %165 : vector<16x1xf32> to vector<16x32xf32>
    %167 = arith.mulf %162, %166 : vector<16x32xf32>
    %168 = vector.broadcast %14 : vector<1x32xf32> to vector<16x32xf32>
    %169 = arith.mulf %167, %168 : vector<16x32xf32>
    %170 = vector.broadcast %15 : vector<1x32xf32> to vector<16x32xf32>
    %171 = arith.addf %169, %170 : vector<16x32xf32>
    %cst_48 = arith.constant dense<0.000000e+00> : vector<16x64xf32>
    %172 = tpu.matmul %171, %9, %cst_48 {dimension_numbers = #tpu.dot_dimension_numbers<[1], [0], [0], [1], [0, 0, 1, 1], [], []>} : vector<16x32xf32>, vector<32x64xf32>, vector<16x64xf32> -> vector<16x64xf32>
    %173 = vector.broadcast %12 : vector<1x64xf32> to vector<16x64xf32>
    %174 = arith.addf %172, %173 : vector<16x64xf32>
    %cst_49 = arith.constant 0.000000e+00 : f32
    %175 = vector.broadcast %cst_49 : f32 to vector<16x64xf32>
    %176 = arith.maximumf %174, %175 : vector<16x64xf32>
    %cst_50 = arith.constant dense<0.000000e+00> : vector<16x32xf32>
    %177 = tpu.matmul %176, %4, %cst_50 {dimension_numbers = #tpu.dot_dimension_numbers<[1], [0], [0], [1], [0, 0, 1, 1], [], []>} : vector<16x64xf32>, vector<64x32xf32>, vector<16x32xf32> -> vector<16x32xf32>
    %178 = vector.broadcast %13 : vector<1x32xf32> to vector<16x32xf32>
    %179 = arith.addf %177, %178 : vector<16x32xf32>
    %180 = arith.addf %171, %179 : vector<16x32xf32>
    %cst_51 = arith.constant dense<0.000000e+00> : vector<16xf32>
    %181 = vector.multi_reduction <add>, %180, %cst_51 [1] : vector<16x32xf32> to vector<16xf32>
    %182 = vector.shape_cast %181 : vector<16xf32> to vector<16x1xf32>
    %cst_52 = arith.constant 3.200000e+01 : f32
    %183 = vector.broadcast %cst_52 : f32 to vector<16x1xf32>
    %184 = arith.divf %182, %183 : vector<16x1xf32>
    %185 = vector.broadcast %184 : vector<16x1xf32> to vector<16x32xf32>
    %186 = arith.subf %180, %185 : vector<16x32xf32>
    %187 = arith.mulf %186, %186 : vector<16x32xf32>
    %cst_53 = arith.constant dense<0.000000e+00> : vector<16xf32>
    %188 = vector.multi_reduction <add>, %187, %cst_53 [1] : vector<16x32xf32> to vector<16xf32>
    %189 = vector.shape_cast %188 : vector<16xf32> to vector<16x1xf32>
    %cst_54 = arith.constant 3.200000e+01 : f32
    %190 = vector.broadcast %cst_54 : f32 to vector<16x1xf32>
    %191 = arith.divf %189, %190 : vector<16x1xf32>
    %192 = vector.broadcast %184 : vector<16x1xf32> to vector<16x32xf32>
    %193 = arith.subf %180, %192 : vector<16x32xf32>
    %cst_55 = arith.constant 9.99999974E-6 : f32
    %194 = vector.broadcast %cst_55 : f32 to vector<16x1xf32>
    %195 = arith.addf %191, %194 : vector<16x1xf32>
    %196 = math.rsqrt %195 : vector<16x1xf32>
    %197 = vector.broadcast %196 : vector<16x1xf32> to vector<16x32xf32>
    %198 = arith.mulf %193, %197 : vector<16x32xf32>
    %199 = vector.broadcast %16 : vector<1x32xf32> to vector<16x32xf32>
    %200 = arith.mulf %198, %199 : vector<16x32xf32>
    %201 = vector.broadcast %17 : vector<1x32xf32> to vector<16x32xf32>
    %202 = arith.addf %200, %201 : vector<16x32xf32>
    %c1 = arith.constant 1 : index
    %c0_56 = arith.constant 0 : index
    %c0_57 = arith.constant 0 : index
    %203 = vector.load %arg2[%c1, %c0_56, %c0_57] : memref<2x32x192xf32, #tpu.memory_space<vmem>>, vector<1x32x192xf32>
    %204 = vector.shape_cast %203 : vector<1x32x192xf32> to vector<32x192xf32>
    %c1_58 = arith.constant 1 : index
    %c0_59 = arith.constant 0 : index
    %c0_60 = arith.constant 0 : index
    %205 = vector.load %arg3[%c1_58, %c0_59, %c0_60] : memref<2x64x32xf32, #tpu.memory_space<vmem>>, vector<1x64x32xf32>
    %206 = vector.shape_cast %205 : vector<1x64x32xf32> to vector<64x32xf32>
    %c1_61 = arith.constant 1 : index
    %c0_62 = arith.constant 0 : index
    %c0_63 = arith.constant 0 : index
    %207 = vector.load %arg4[%c1_61, %c0_62, %c0_63] : memref<2x8x128xf32, #tpu.memory_space<vmem>>, vector<1x8x128xf32>
    %208 = vector.shape_cast %207 : vector<1x8x128xf32> to vector<8x128xf32>
    %209 = vector.extract_strided_slice %204 {offsets = [0, 0], sizes = [32, 96], strides = [1, 1]} : vector<32x192xf32> to vector<32x96xf32>
    %210 = vector.extract_strided_slice %204 {offsets = [0, 96], sizes = [32, 32], strides = [1, 1]} : vector<32x192xf32> to vector<32x32xf32>
    %211 = vector.extract_strided_slice %204 {offsets = [0, 128], sizes = [32, 64], strides = [1, 1]} : vector<32x192xf32> to vector<32x64xf32>
    %212 = vector.extract_strided_slice %208 {offsets = [0, 0], sizes = [1, 96], strides = [1, 1]} : vector<8x128xf32> to vector<1x96xf32>
    %213 = vector.extract_strided_slice %208 {offsets = [1, 0], sizes = [1, 32], strides = [1, 1]} : vector<8x128xf32> to vector<1x32xf32>
    %214 = vector.extract_strided_slice %208 {offsets = [2, 0], sizes = [1, 64], strides = [1, 1]} : vector<8x128xf32> to vector<1x64xf32>
    %215 = vector.extract_strided_slice %208 {offsets = [3, 0], sizes = [1, 32], strides = [1, 1]} : vector<8x128xf32> to vector<1x32xf32>
    %216 = vector.extract_strided_slice %208 {offsets = [4, 0], sizes = [1, 32], strides = [1, 1]} : vector<8x128xf32> to vector<1x32xf32>
    %217 = vector.extract_strided_slice %208 {offsets = [5, 0], sizes = [1, 32], strides = [1, 1]} : vector<8x128xf32> to vector<1x32xf32>
    %218 = vector.extract_strided_slice %208 {offsets = [6, 0], sizes = [1, 32], strides = [1, 1]} : vector<8x128xf32> to vector<1x32xf32>
    %219 = vector.extract_strided_slice %208 {offsets = [7, 0], sizes = [1, 32], strides = [1, 1]} : vector<8x128xf32> to vector<1x32xf32>
    %cst_64 = arith.constant dense<0.000000e+00> : vector<16x96xf32>
    %220 = tpu.matmul %202, %209, %cst_64 {dimension_numbers = #tpu.dot_dimension_numbers<[1], [0], [0], [1], [0, 0, 1, 1], [], []>} : vector<16x32xf32>, vector<32x96xf32>, vector<16x96xf32> -> vector<16x96xf32>
    %221 = vector.broadcast %212 : vector<1x96xf32> to vector<16x96xf32>
    %222 = arith.addf %220, %221 : vector<16x96xf32>
    %223 = vector.extract_strided_slice %222 {offsets = [0, 0], sizes = [8, 96], strides = [1, 1]} : vector<16x96xf32> to vector<8x96xf32>
    %224 = vector.extract_strided_slice %223 {offsets = [0, 0], sizes = [8, 8], strides = [1, 1]} : vector<8x96xf32> to vector<8x8xf32>
    %225 = vector.extract_strided_slice %223 {offsets = [0, 32], sizes = [8, 8], strides = [1, 1]} : vector<8x96xf32> to vector<8x8xf32>
    %226 = vector.extract_strided_slice %223 {offsets = [0, 64], sizes = [8, 8], strides = [1, 1]} : vector<8x96xf32> to vector<8x8xf32>
    %cst_65 = arith.constant dense<0.000000e+00> : vector<8x8xf32>
    %227 = tpu.matmul %224, %225, %cst_65 {dimension_numbers = #tpu.dot_dimension_numbers<[1], [1], [0], [0], [0, 0, 1, 0], [], []>} : vector<8x8xf32>, vector<8x8xf32>, vector<8x8xf32> -> vector<8x8xf32>
    %cst_66 = arith.constant dense<0xFF800000> : vector<8xf32>
    %228 = vector.multi_reduction <maximumf>, %227, %cst_66 [1] : vector<8x8xf32> to vector<8xf32>
    %229 = vector.shape_cast %228 : vector<8xf32> to vector<8x1xf32>
    %230 = vector.broadcast %229 : vector<8x1xf32> to vector<8x8xf32>
    %231 = arith.subf %227, %230 : vector<8x8xf32>
    %232 = math.exp %231 : vector<8x8xf32>
    %cst_67 = arith.constant dense<0.000000e+00> : vector<8xf32>
    %233 = vector.multi_reduction <add>, %232, %cst_67 [1] : vector<8x8xf32> to vector<8xf32>
    %234 = vector.shape_cast %233 : vector<8xf32> to vector<8x1xf32>
    %235 = tpu.reciprocal %234 : vector<8x1xf32> -> vector<8x1xf32>
    %236 = vector.broadcast %235 : vector<8x1xf32> to vector<8x8xf32>
    %237 = arith.mulf %232, %236 : vector<8x8xf32>
    %cst_68 = arith.constant dense<0.000000e+00> : vector<8x8xf32>
    %238 = tpu.matmul %237, %226, %cst_68 {dimension_numbers = #tpu.dot_dimension_numbers<[1], [0], [0], [1], [0, 0, 1, 1], [], []>} : vector<8x8xf32>, vector<8x8xf32>, vector<8x8xf32> -> vector<8x8xf32>
    %239 = vector.extract_strided_slice %223 {offsets = [0, 8], sizes = [8, 8], strides = [1, 1]} : vector<8x96xf32> to vector<8x8xf32>
    %240 = vector.extract_strided_slice %223 {offsets = [0, 40], sizes = [8, 8], strides = [1, 1]} : vector<8x96xf32> to vector<8x8xf32>
    %241 = vector.extract_strided_slice %223 {offsets = [0, 72], sizes = [8, 8], strides = [1, 1]} : vector<8x96xf32> to vector<8x8xf32>
    %cst_69 = arith.constant dense<0.000000e+00> : vector<8x8xf32>
    %242 = tpu.matmul %239, %240, %cst_69 {dimension_numbers = #tpu.dot_dimension_numbers<[1], [1], [0], [0], [0, 0, 1, 0], [], []>} : vector<8x8xf32>, vector<8x8xf32>, vector<8x8xf32> -> vector<8x8xf32>
    %cst_70 = arith.constant dense<0xFF800000> : vector<8xf32>
    %243 = vector.multi_reduction <maximumf>, %242, %cst_70 [1] : vector<8x8xf32> to vector<8xf32>
    %244 = vector.shape_cast %243 : vector<8xf32> to vector<8x1xf32>
    %245 = vector.broadcast %244 : vector<8x1xf32> to vector<8x8xf32>
    %246 = arith.subf %242, %245 : vector<8x8xf32>
    %247 = math.exp %246 : vector<8x8xf32>
    %cst_71 = arith.constant dense<0.000000e+00> : vector<8xf32>
    %248 = vector.multi_reduction <add>, %247, %cst_71 [1] : vector<8x8xf32> to vector<8xf32>
    %249 = vector.shape_cast %248 : vector<8xf32> to vector<8x1xf32>
    %250 = tpu.reciprocal %249 : vector<8x1xf32> -> vector<8x1xf32>
    %251 = vector.broadcast %250 : vector<8x1xf32> to vector<8x8xf32>
    %252 = arith.mulf %247, %251 : vector<8x8xf32>
    %cst_72 = arith.constant dense<0.000000e+00> : vector<8x8xf32>
    %253 = tpu.matmul %252, %241, %cst_72 {dimension_numbers = #tpu.dot_dimension_numbers<[1], [0], [0], [1], [0, 0, 1, 1], [], []>} : vector<8x8xf32>, vector<8x8xf32>, vector<8x8xf32> -> vector<8x8xf32>
    %254 = vector.extract_strided_slice %223 {offsets = [0, 16], sizes = [8, 8], strides = [1, 1]} : vector<8x96xf32> to vector<8x8xf32>
    %255 = vector.extract_strided_slice %223 {offsets = [0, 48], sizes = [8, 8], strides = [1, 1]} : vector<8x96xf32> to vector<8x8xf32>
    %256 = vector.extract_strided_slice %223 {offsets = [0, 80], sizes = [8, 8], strides = [1, 1]} : vector<8x96xf32> to vector<8x8xf32>
    %cst_73 = arith.constant dense<0.000000e+00> : vector<8x8xf32>
    %257 = tpu.matmul %254, %255, %cst_73 {dimension_numbers = #tpu.dot_dimension_numbers<[1], [1], [0], [0], [0, 0, 1, 0], [], []>} : vector<8x8xf32>, vector<8x8xf32>, vector<8x8xf32> -> vector<8x8xf32>
    %cst_74 = arith.constant dense<0xFF800000> : vector<8xf32>
    %258 = vector.multi_reduction <maximumf>, %257, %cst_74 [1] : vector<8x8xf32> to vector<8xf32>
    %259 = vector.shape_cast %258 : vector<8xf32> to vector<8x1xf32>
    %260 = vector.broadcast %259 : vector<8x1xf32> to vector<8x8xf32>
    %261 = arith.subf %257, %260 : vector<8x8xf32>
    %262 = math.exp %261 : vector<8x8xf32>
    %cst_75 = arith.constant dense<0.000000e+00> : vector<8xf32>
    %263 = vector.multi_reduction <add>, %262, %cst_75 [1] : vector<8x8xf32> to vector<8xf32>
    %264 = vector.shape_cast %263 : vector<8xf32> to vector<8x1xf32>
    %265 = tpu.reciprocal %264 : vector<8x1xf32> -> vector<8x1xf32>
    %266 = vector.broadcast %265 : vector<8x1xf32> to vector<8x8xf32>
    %267 = arith.mulf %262, %266 : vector<8x8xf32>
    %cst_76 = arith.constant dense<0.000000e+00> : vector<8x8xf32>
    %268 = tpu.matmul %267, %256, %cst_76 {dimension_numbers = #tpu.dot_dimension_numbers<[1], [0], [0], [1], [0, 0, 1, 1], [], []>} : vector<8x8xf32>, vector<8x8xf32>, vector<8x8xf32> -> vector<8x8xf32>
    %269 = vector.extract_strided_slice %223 {offsets = [0, 24], sizes = [8, 8], strides = [1, 1]} : vector<8x96xf32> to vector<8x8xf32>
    %270 = vector.extract_strided_slice %223 {offsets = [0, 56], sizes = [8, 8], strides = [1, 1]} : vector<8x96xf32> to vector<8x8xf32>
    %271 = vector.extract_strided_slice %223 {offsets = [0, 88], sizes = [8, 8], strides = [1, 1]} : vector<8x96xf32> to vector<8x8xf32>
    %cst_77 = arith.constant dense<0.000000e+00> : vector<8x8xf32>
    %272 = tpu.matmul %269, %270, %cst_77 {dimension_numbers = #tpu.dot_dimension_numbers<[1], [1], [0], [0], [0, 0, 1, 0], [], []>} : vector<8x8xf32>, vector<8x8xf32>, vector<8x8xf32> -> vector<8x8xf32>
    %cst_78 = arith.constant dense<0xFF800000> : vector<8xf32>
    %273 = vector.multi_reduction <maximumf>, %272, %cst_78 [1] : vector<8x8xf32> to vector<8xf32>
    %274 = vector.shape_cast %273 : vector<8xf32> to vector<8x1xf32>
    %275 = vector.broadcast %274 : vector<8x1xf32> to vector<8x8xf32>
    %276 = arith.subf %272, %275 : vector<8x8xf32>
    %277 = math.exp %276 : vector<8x8xf32>
    %cst_79 = arith.constant dense<0.000000e+00> : vector<8xf32>
    %278 = vector.multi_reduction <add>, %277, %cst_79 [1] : vector<8x8xf32> to vector<8xf32>
    %279 = vector.shape_cast %278 : vector<8xf32> to vector<8x1xf32>
    %280 = tpu.reciprocal %279 : vector<8x1xf32> -> vector<8x1xf32>
    %281 = vector.broadcast %280 : vector<8x1xf32> to vector<8x8xf32>
    %282 = arith.mulf %277, %281 : vector<8x8xf32>
    %cst_80 = arith.constant dense<0.000000e+00> : vector<8x8xf32>
    %283 = tpu.matmul %282, %271, %cst_80 {dimension_numbers = #tpu.dot_dimension_numbers<[1], [0], [0], [1], [0, 0, 1, 1], [], []>} : vector<8x8xf32>, vector<8x8xf32>, vector<8x8xf32> -> vector<8x8xf32>
    %284 = tpu.concatenate %238, %253, %268, %283 in 1 : vector<8x8xf32>, vector<8x8xf32>, vector<8x8xf32>, vector<8x8xf32> -> vector<8x32xf32>
    %285 = vector.extract_strided_slice %222 {offsets = [8, 0], sizes = [8, 96], strides = [1, 1]} : vector<16x96xf32> to vector<8x96xf32>
    %286 = vector.extract_strided_slice %285 {offsets = [0, 0], sizes = [8, 8], strides = [1, 1]} : vector<8x96xf32> to vector<8x8xf32>
    %287 = vector.extract_strided_slice %285 {offsets = [0, 32], sizes = [8, 8], strides = [1, 1]} : vector<8x96xf32> to vector<8x8xf32>
    %288 = vector.extract_strided_slice %285 {offsets = [0, 64], sizes = [8, 8], strides = [1, 1]} : vector<8x96xf32> to vector<8x8xf32>
    %cst_81 = arith.constant dense<0.000000e+00> : vector<8x8xf32>
    %289 = tpu.matmul %286, %287, %cst_81 {dimension_numbers = #tpu.dot_dimension_numbers<[1], [1], [0], [0], [0, 0, 1, 0], [], []>} : vector<8x8xf32>, vector<8x8xf32>, vector<8x8xf32> -> vector<8x8xf32>
    %cst_82 = arith.constant dense<0xFF800000> : vector<8xf32>
    %290 = vector.multi_reduction <maximumf>, %289, %cst_82 [1] : vector<8x8xf32> to vector<8xf32>
    %291 = vector.shape_cast %290 : vector<8xf32> to vector<8x1xf32>
    %292 = vector.broadcast %291 : vector<8x1xf32> to vector<8x8xf32>
    %293 = arith.subf %289, %292 : vector<8x8xf32>
    %294 = math.exp %293 : vector<8x8xf32>
    %cst_83 = arith.constant dense<0.000000e+00> : vector<8xf32>
    %295 = vector.multi_reduction <add>, %294, %cst_83 [1] : vector<8x8xf32> to vector<8xf32>
    %296 = vector.shape_cast %295 : vector<8xf32> to vector<8x1xf32>
    %297 = tpu.reciprocal %296 : vector<8x1xf32> -> vector<8x1xf32>
    %298 = vector.broadcast %297 : vector<8x1xf32> to vector<8x8xf32>
    %299 = arith.mulf %294, %298 : vector<8x8xf32>
    %cst_84 = arith.constant dense<0.000000e+00> : vector<8x8xf32>
    %300 = tpu.matmul %299, %288, %cst_84 {dimension_numbers = #tpu.dot_dimension_numbers<[1], [0], [0], [1], [0, 0, 1, 1], [], []>} : vector<8x8xf32>, vector<8x8xf32>, vector<8x8xf32> -> vector<8x8xf32>
    %301 = vector.extract_strided_slice %285 {offsets = [0, 8], sizes = [8, 8], strides = [1, 1]} : vector<8x96xf32> to vector<8x8xf32>
    %302 = vector.extract_strided_slice %285 {offsets = [0, 40], sizes = [8, 8], strides = [1, 1]} : vector<8x96xf32> to vector<8x8xf32>
    %303 = vector.extract_strided_slice %285 {offsets = [0, 72], sizes = [8, 8], strides = [1, 1]} : vector<8x96xf32> to vector<8x8xf32>
    %cst_85 = arith.constant dense<0.000000e+00> : vector<8x8xf32>
    %304 = tpu.matmul %301, %302, %cst_85 {dimension_numbers = #tpu.dot_dimension_numbers<[1], [1], [0], [0], [0, 0, 1, 0], [], []>} : vector<8x8xf32>, vector<8x8xf32>, vector<8x8xf32> -> vector<8x8xf32>
    %cst_86 = arith.constant dense<0xFF800000> : vector<8xf32>
    %305 = vector.multi_reduction <maximumf>, %304, %cst_86 [1] : vector<8x8xf32> to vector<8xf32>
    %306 = vector.shape_cast %305 : vector<8xf32> to vector<8x1xf32>
    %307 = vector.broadcast %306 : vector<8x1xf32> to vector<8x8xf32>
    %308 = arith.subf %304, %307 : vector<8x8xf32>
    %309 = math.exp %308 : vector<8x8xf32>
    %cst_87 = arith.constant dense<0.000000e+00> : vector<8xf32>
    %310 = vector.multi_reduction <add>, %309, %cst_87 [1] : vector<8x8xf32> to vector<8xf32>
    %311 = vector.shape_cast %310 : vector<8xf32> to vector<8x1xf32>
    %312 = tpu.reciprocal %311 : vector<8x1xf32> -> vector<8x1xf32>
    %313 = vector.broadcast %312 : vector<8x1xf32> to vector<8x8xf32>
    %314 = arith.mulf %309, %313 : vector<8x8xf32>
    %cst_88 = arith.constant dense<0.000000e+00> : vector<8x8xf32>
    %315 = tpu.matmul %314, %303, %cst_88 {dimension_numbers = #tpu.dot_dimension_numbers<[1], [0], [0], [1], [0, 0, 1, 1], [], []>} : vector<8x8xf32>, vector<8x8xf32>, vector<8x8xf32> -> vector<8x8xf32>
    %316 = vector.extract_strided_slice %285 {offsets = [0, 16], sizes = [8, 8], strides = [1, 1]} : vector<8x96xf32> to vector<8x8xf32>
    %317 = vector.extract_strided_slice %285 {offsets = [0, 48], sizes = [8, 8], strides = [1, 1]} : vector<8x96xf32> to vector<8x8xf32>
    %318 = vector.extract_strided_slice %285 {offsets = [0, 80], sizes = [8, 8], strides = [1, 1]} : vector<8x96xf32> to vector<8x8xf32>
    %cst_89 = arith.constant dense<0.000000e+00> : vector<8x8xf32>
    %319 = tpu.matmul %316, %317, %cst_89 {dimension_numbers = #tpu.dot_dimension_numbers<[1], [1], [0], [0], [0, 0, 1, 0], [], []>} : vector<8x8xf32>, vector<8x8xf32>, vector<8x8xf32> -> vector<8x8xf32>
    %cst_90 = arith.constant dense<0xFF800000> : vector<8xf32>
    %320 = vector.multi_reduction <maximumf>, %319, %cst_90 [1] : vector<8x8xf32> to vector<8xf32>
    %321 = vector.shape_cast %320 : vector<8xf32> to vector<8x1xf32>
    %322 = vector.broadcast %321 : vector<8x1xf32> to vector<8x8xf32>
    %323 = arith.subf %319, %322 : vector<8x8xf32>
    %324 = math.exp %323 : vector<8x8xf32>
    %cst_91 = arith.constant dense<0.000000e+00> : vector<8xf32>
    %325 = vector.multi_reduction <add>, %324, %cst_91 [1] : vector<8x8xf32> to vector<8xf32>
    %326 = vector.shape_cast %325 : vector<8xf32> to vector<8x1xf32>
    %327 = tpu.reciprocal %326 : vector<8x1xf32> -> vector<8x1xf32>
    %328 = vector.broadcast %327 : vector<8x1xf32> to vector<8x8xf32>
    %329 = arith.mulf %324, %328 : vector<8x8xf32>
    %cst_92 = arith.constant dense<0.000000e+00> : vector<8x8xf32>
    %330 = tpu.matmul %329, %318, %cst_92 {dimension_numbers = #tpu.dot_dimension_numbers<[1], [0], [0], [1], [0, 0, 1, 1], [], []>} : vector<8x8xf32>, vector<8x8xf32>, vector<8x8xf32> -> vector<8x8xf32>
    %331 = vector.extract_strided_slice %285 {offsets = [0, 24], sizes = [8, 8], strides = [1, 1]} : vector<8x96xf32> to vector<8x8xf32>
    %332 = vector.extract_strided_slice %285 {offsets = [0, 56], sizes = [8, 8], strides = [1, 1]} : vector<8x96xf32> to vector<8x8xf32>
    %333 = vector.extract_strided_slice %285 {offsets = [0, 88], sizes = [8, 8], strides = [1, 1]} : vector<8x96xf32> to vector<8x8xf32>
    %cst_93 = arith.constant dense<0.000000e+00> : vector<8x8xf32>
    %334 = tpu.matmul %331, %332, %cst_93 {dimension_numbers = #tpu.dot_dimension_numbers<[1], [1], [0], [0], [0, 0, 1, 0], [], []>} : vector<8x8xf32>, vector<8x8xf32>, vector<8x8xf32> -> vector<8x8xf32>
    %cst_94 = arith.constant dense<0xFF800000> : vector<8xf32>
    %335 = vector.multi_reduction <maximumf>, %334, %cst_94 [1] : vector<8x8xf32> to vector<8xf32>
    %336 = vector.shape_cast %335 : vector<8xf32> to vector<8x1xf32>
    %337 = vector.broadcast %336 : vector<8x1xf32> to vector<8x8xf32>
    %338 = arith.subf %334, %337 : vector<8x8xf32>
    %339 = math.exp %338 : vector<8x8xf32>
    %cst_95 = arith.constant dense<0.000000e+00> : vector<8xf32>
    %340 = vector.multi_reduction <add>, %339, %cst_95 [1] : vector<8x8xf32> to vector<8xf32>
    %341 = vector.shape_cast %340 : vector<8xf32> to vector<8x1xf32>
    %342 = tpu.reciprocal %341 : vector<8x1xf32> -> vector<8x1xf32>
    %343 = vector.broadcast %342 : vector<8x1xf32> to vector<8x8xf32>
    %344 = arith.mulf %339, %343 : vector<8x8xf32>
    %cst_96 = arith.constant dense<0.000000e+00> : vector<8x8xf32>
    %345 = tpu.matmul %344, %333, %cst_96 {dimension_numbers = #tpu.dot_dimension_numbers<[1], [0], [0], [1], [0, 0, 1, 1], [], []>} : vector<8x8xf32>, vector<8x8xf32>, vector<8x8xf32> -> vector<8x8xf32>
    %346 = tpu.concatenate %300, %315, %330, %345 in 1 : vector<8x8xf32>, vector<8x8xf32>, vector<8x8xf32>, vector<8x8xf32> -> vector<8x32xf32>
    %347 = tpu.concatenate %284, %346 in 0 : vector<8x32xf32>, vector<8x32xf32> -> vector<16x32xf32>
    %cst_97 = arith.constant dense<0.000000e+00> : vector<16x32xf32>
    %348 = tpu.matmul %347, %210, %cst_97 {dimension_numbers = #tpu.dot_dimension_numbers<[1], [0], [0], [1], [0, 0, 1, 1], [], []>} : vector<16x32xf32>, vector<32x32xf32>, vector<16x32xf32> -> vector<16x32xf32>
    %349 = vector.broadcast %213 : vector<1x32xf32> to vector<16x32xf32>
    %350 = arith.addf %348, %349 : vector<16x32xf32>
    %351 = arith.addf %202, %350 : vector<16x32xf32>
    %cst_98 = arith.constant dense<0.000000e+00> : vector<16xf32>
    %352 = vector.multi_reduction <add>, %351, %cst_98 [1] : vector<16x32xf32> to vector<16xf32>
    %353 = vector.shape_cast %352 : vector<16xf32> to vector<16x1xf32>
    %cst_99 = arith.constant 3.200000e+01 : f32
    %354 = vector.broadcast %cst_99 : f32 to vector<16x1xf32>
    %355 = arith.divf %353, %354 : vector<16x1xf32>
    %356 = vector.broadcast %355 : vector<16x1xf32> to vector<16x32xf32>
    %357 = arith.subf %351, %356 : vector<16x32xf32>
    %358 = arith.mulf %357, %357 : vector<16x32xf32>
    %cst_100 = arith.constant dense<0.000000e+00> : vector<16xf32>
    %359 = vector.multi_reduction <add>, %358, %cst_100 [1] : vector<16x32xf32> to vector<16xf32>
    %360 = vector.shape_cast %359 : vector<16xf32> to vector<16x1xf32>
    %cst_101 = arith.constant 3.200000e+01 : f32
    %361 = vector.broadcast %cst_101 : f32 to vector<16x1xf32>
    %362 = arith.divf %360, %361 : vector<16x1xf32>
    %363 = vector.broadcast %355 : vector<16x1xf32> to vector<16x32xf32>
    %364 = arith.subf %351, %363 : vector<16x32xf32>
    %cst_102 = arith.constant 9.99999974E-6 : f32
    %365 = vector.broadcast %cst_102 : f32 to vector<16x1xf32>
    %366 = arith.addf %362, %365 : vector<16x1xf32>
    %367 = math.rsqrt %366 : vector<16x1xf32>
    %368 = vector.broadcast %367 : vector<16x1xf32> to vector<16x32xf32>
    %369 = arith.mulf %364, %368 : vector<16x32xf32>
    %370 = vector.broadcast %216 : vector<1x32xf32> to vector<16x32xf32>
    %371 = arith.mulf %369, %370 : vector<16x32xf32>
    %372 = vector.broadcast %217 : vector<1x32xf32> to vector<16x32xf32>
    %373 = arith.addf %371, %372 : vector<16x32xf32>
    %cst_103 = arith.constant dense<0.000000e+00> : vector<16x64xf32>
    %374 = tpu.matmul %373, %211, %cst_103 {dimension_numbers = #tpu.dot_dimension_numbers<[1], [0], [0], [1], [0, 0, 1, 1], [], []>} : vector<16x32xf32>, vector<32x64xf32>, vector<16x64xf32> -> vector<16x64xf32>
    %375 = vector.broadcast %214 : vector<1x64xf32> to vector<16x64xf32>
    %376 = arith.addf %374, %375 : vector<16x64xf32>
    %cst_104 = arith.constant 0.000000e+00 : f32
    %377 = vector.broadcast %cst_104 : f32 to vector<16x64xf32>
    %378 = arith.maximumf %376, %377 : vector<16x64xf32>
    %cst_105 = arith.constant dense<0.000000e+00> : vector<16x32xf32>
    %379 = tpu.matmul %378, %206, %cst_105 {dimension_numbers = #tpu.dot_dimension_numbers<[1], [0], [0], [1], [0, 0, 1, 1], [], []>} : vector<16x64xf32>, vector<64x32xf32>, vector<16x32xf32> -> vector<16x32xf32>
    %380 = vector.broadcast %215 : vector<1x32xf32> to vector<16x32xf32>
    %381 = arith.addf %379, %380 : vector<16x32xf32>
    %382 = arith.addf %373, %381 : vector<16x32xf32>
    %cst_106 = arith.constant dense<0.000000e+00> : vector<16xf32>
    %383 = vector.multi_reduction <add>, %382, %cst_106 [1] : vector<16x32xf32> to vector<16xf32>
    %384 = vector.shape_cast %383 : vector<16xf32> to vector<16x1xf32>
    %cst_107 = arith.constant 3.200000e+01 : f32
    %385 = vector.broadcast %cst_107 : f32 to vector<16x1xf32>
    %386 = arith.divf %384, %385 : vector<16x1xf32>
    %387 = vector.broadcast %386 : vector<16x1xf32> to vector<16x32xf32>
    %388 = arith.subf %382, %387 : vector<16x32xf32>
    %389 = arith.mulf %388, %388 : vector<16x32xf32>
    %cst_108 = arith.constant dense<0.000000e+00> : vector<16xf32>
    %390 = vector.multi_reduction <add>, %389, %cst_108 [1] : vector<16x32xf32> to vector<16xf32>
    %391 = vector.shape_cast %390 : vector<16xf32> to vector<16x1xf32>
    %cst_109 = arith.constant 3.200000e+01 : f32
    %392 = vector.broadcast %cst_109 : f32 to vector<16x1xf32>
    %393 = arith.divf %391, %392 : vector<16x1xf32>
    %394 = vector.broadcast %386 : vector<16x1xf32> to vector<16x32xf32>
    %395 = arith.subf %382, %394 : vector<16x32xf32>
    %cst_110 = arith.constant 9.99999974E-6 : f32
    %396 = vector.broadcast %cst_110 : f32 to vector<16x1xf32>
    %397 = arith.addf %393, %396 : vector<16x1xf32>
    %398 = math.rsqrt %397 : vector<16x1xf32>
    %399 = vector.broadcast %398 : vector<16x1xf32> to vector<16x32xf32>
    %400 = arith.mulf %395, %399 : vector<16x32xf32>
    %401 = vector.broadcast %218 : vector<1x32xf32> to vector<16x32xf32>
    %402 = arith.mulf %400, %401 : vector<16x32xf32>
    %403 = vector.broadcast %219 : vector<1x32xf32> to vector<16x32xf32>
    %404 = arith.addf %402, %403 : vector<16x32xf32>
    %c0_111 = arith.constant 0 : index
    %c0_112 = arith.constant 0 : index
    %405 = vector.load %arg5[%c0_111, %c0_112] : memref<16x32xf32, #tpu.memory_space<vmem>>, vector<16x32xf32>
    tpu.vector_store %arg5[%c0_111, %c0_112], %404 {strides = array<i32>} : memref<16x32xf32, #tpu.memory_space<vmem>>, vector<16x32xf32>,
    return
  }
  func.func @transform_0(%arg0: i32) -> (i32, i32) {
    %c0_i32 = arith.constant 0 : i32
    %c0_i32_0 = arith.constant 0 : i32
    %c0_i32_1 = arith.constant 0 : i32
    return %c0_i32, %c0_i32_0 : i32, i32
  }
  func.func @transform_1(%arg0: i32) -> (i32, i32, i32) {
    %c0_i32 = arith.constant 0 : i32
    %c0_i32_0 = arith.constant 0 : i32
    %c0_i32_1 = arith.constant 0 : i32
    %c0_i32_2 = arith.constant 0 : i32
    return %c0_i32, %c0_i32_0, %c0_i32_1 : i32, i32, i32
  }
  func.func @transform_2(%arg0: i32) -> (i32, i32, i32) {
    %c0_i32 = arith.constant 0 : i32
    %c0_i32_0 = arith.constant 0 : i32
    %c0_i32_1 = arith.constant 0 : i32
    %c0_i32_2 = arith.constant 0 : i32
    return %c0_i32, %c0_i32_0, %c0_i32_1 : i32, i32, i32
  }
  func.func @transform_3(%arg0: i32) -> (i32, i32, i32) {
    %c0_i32 = arith.constant 0 : i32
    %c0_i32_0 = arith.constant 0 : i32
    %c0_i32_1 = arith.constant 0 : i32
    %c0_i32_2 = arith.constant 0 : i32
    return %c0_i32, %c0_i32_0, %c0_i32_1 : i32, i32, i32
  }
  func.func @transform_4(%arg0: i32) -> (i32, i32) {
    %c0_i32 = arith.constant 0 : i32
    %c0_i32_0 = arith.constant 0 : i32
    %c0_i32_1 = arith.constant 0 : i32
    return %c0_i32, %c0_i32_0 : i32, i32
  }
}

</mosaic_0001>

<bundles_post_ra>
// kernel: tpu_custom_call.1
= control target key start
LH: loop header
LB: loop body
LE: loop exit
PB: predicated region body
PF: predicated region fallthrough
CT: control target
= control target key end

     0   :  { %vm41_vm0 = vcmask 261120   ;;  %s4995_s0 = inlined_call_operand.vmem [shape: f32[16,32], index: 0, kind: input, shape index: {}]   ;;  %s4996_s1 = inlined_call_operand.vmem [shape: f32[2,32,192], index: 1, kind: input, shape index: {}]   ;;  %s4997_s2 = inlined_call_operand.vmem [shape: f32[2,64,32], index: 2, kind: input, shape index: {}]   ;;  %s4998_s3 = inlined_call_operand.vmem [shape: f32[2,8,128], index: 3, kind: input, shape index: {}]   ;;  %s4999_s4 = inlined_call_operand.hbm [shape: f32[16,32], index: 4, kind: output, shape index: {}]  }
   0x1   :  { %v4388_v0 = vld [vmem:[%s4996_s1] sm:$0xff]  ;;  %v4393_v1 = vld [vmem:[%s4996_s1 + $0x10] sm:$0xff] }
   0x2   :  { %v4398_v2 = vld [vmem:[%s4996_s1 + $0x20] sm:$0xff]  ;;  %v4217_v3 = vpack.i.bf16 %v4393_v1, %v4388_v0  ;;  %v4118_v4 = vpack.c.bf16 %v4393_v1, %v4388_v0  ;;  %v4407_v5 = vld [vmem:[%s4996_s1 + $0x30] sm:$0xff] }
   0x3   :  { %v4412_v6 = vld [vmem:[%s4995_s0] sm:$0xff]  ;;  %v4122_v7 = vpack.c.bf16 %v4407_v5, %v4398_v2 }
   0x4   :  { %3862 = vmatprep.mubr.msk.f32.mxu1 %vm41_vm0, %v4412_v6 }
   0x5   :  { %9 = vsyncpa [#allocation3], 0  ;;  %4119 = vmatprep.subr.bf16.mxu1 %v4118_v4  ;;  %v4421_v8 = vld [vmem:[%s4995_s0 + $0x8] sm:$0xff]  ;;  %v4341_v9 = vmov 0.0   ;;  %v37_v10 = vlaneseq  ;;  %vm4342_vm1 = vmmov 0   ;;  %v4437_v13 = vld [vmem:[%s4998_s3] sm:$0xff] }
   0x6   :  { %4121 = vmatpush3.bf16.msra.mxu1 %v4118_v4  ;;  %3875 = vmatprep.subr.mxu0 %v4341_v9  ;;  %s4343_s28 = smov 120   ;;  %s4344_s29 = smov 96   ;;  %vm126_vm2 = vcmask 64512   ;;  %vm796_vm3 = vcmask 130048   ;;  %vm798_vm4 = vcmask 195584   ;;  %vm1707_vm5 = vcmask 523264  }
   0x7   :  { %4123 = vmatprep.subr.bf16.mxu1 %v4122_v7  ;;  %v4427_v11 = vshrl.u32 %v37_v10, 7  ;;  %3877 = vmatprep.mubr.msk.f32.mxu0 %vm4342_vm1, %v4341_v9  ;;  %s4345_s30 = smov 80   ;;  %s4346_s5 = smov 88  }
   0x8   :  { %s4347_s6 = smov 72   ;;  %s4348_s7 = smov 112  }
   0x9   :  { %v39_v12 = vsub.s32 0, %v4427_v11  ;;  %s4349_s8 = smov 104   ;;  %s4350_s9 = smov 56  }
   0xa   :  { %4125 = vmatpush3.bf16.msra.mxu1 %v4122_v7  ;;  %s4351_s10 = smov 64   ;;  %s4352_s11 = smov 40  }
   0xb   :  { %3865 = vmatprep.subr.mxu1 %v4341_v9  ;;  %v40_v14 = vrot.slane %v4437_v13, %v39_v12  ;;  %s4353_s12 = smov 48   ;;  %s4354_s13 = smov 32  }
   0xc   :  { %s4355_s14 = smov 8   ;;  %s4356_s15 = smov 16  }
   0xd   :  { %3863 = vmatmul.mubr.msk.f32.vlgmr.msra.gmra.mrb[0].mxu1 %vm41_vm0, %v4421_v8  ;;  %s4357_s16 = smov 24  }
   0xe   :  { %3867 = vmatprep.mubr.msk.f32.mxu1 %vm4342_vm1, %v4341_v9 }
  0xe0   :  { %v3864_v15 = vpop.f32.mrb[0].mxu1 }
  0xe1   :  { %v114_v16 = vpop.f32.mrb[1].mxu1  ;;  %v4456_v18 = vadd.f32 %v3864_v15, %v40_v14 }
  0xe2   :  { %v4442_v17 = vadd.f32 %v114_v16, %v40_v14 }
  0xe4   :  { %288 = vrot.lane.b32.xlu1 %v4442_v17, %s4343_s28  ;;  %124 = vrot.lane.b32.xlu0 %v4442_v17, %s4344_s29 }
  0xe8   :  { %455 = vrot.lane.b32.xlu1 %v4442_v17, %s4345_s30  ;;  %290 = vrot.lane.b32.xlu0 %v4442_v17, %s4346_s5 }
  0xec   :  { %620 = vrot.lane.b32.xlu1 %v4442_v17, %s4347_s6  ;;  %453 = vrot.lane.b32.xlu0 %v4442_v17, %s4348_s7 }
  0xf0   :  { %801 = vrot.lane.b32.xlu1 %v4456_v18, %s4344_s29  ;;  %618 = vrot.lane.b32.xlu0 %v4442_v17, %s4349_s8 }
  0xf4   :  { %964 = vrot.lane.b32.xlu1 %v4456_v18, %s4343_s28  ;;  %966 = vrot.lane.b32.xlu0 %v4456_v18, %s4346_s5 }
  0xf8   :  { %1129 = vrot.lane.b32.xlu1 %v4456_v18, %s4348_s7  ;;  %1131 = vrot.lane.b32.xlu0 %v4456_v18, %s4345_s30 }
  0xfc   :  { %1294 = vrot.lane.b32.xlu1 %v4456_v18, %s4349_s8  ;;  %1296 = vrot.lane.b32.xlu0 %v4456_v18, %s4347_s6 }
 0x100   :  { %377 = vrot.lane.b32.xlu1 %v4442_v17, %s4350_s9  ;;  %212 = vrot.lane.b32.xlu0 %v4442_v17, %s4351_s10 }
 0x156   :  { %v289_v19 = vpop.permute.xlu1 %288  ;;  %v125_v20 = vpop.permute.xlu0 %124 }
 0x157   :  { %3866 = vmatpush3.xpose.msk.msra.mxu1 %vm126_vm2, %v125_v20 }
 0x158   :  { %3870 = vmatprep.subr.mxu1 %v4341_v9 }
 0x15a   :  { %v456_v21 = vpop.permute.xlu1 %455  ;;  %3868 = vmatmul.mubr.msk.f32.vlgmr.msra.gmra.mrb[2].mxu1 %vm126_vm2, %v4442_v17  ;;  %v291_v22 = vpop.permute.xlu0 %290 }
 0x15b   :  { %3876 = vmatpush3.xpose.msk.msra.mxu0 %vm126_vm2, %v291_v22  ;;  %3872 = vmatprep.mubr.msk.f32.mxu1 %vm4342_vm1, %v4341_v9 }
 0x15c   :  { %3885 = vmatprep.subr.mxu0 %v4341_v9 }
 0x15e   :  { %v621_v23 = vpop.permute.xlu1 %620  ;;  %3878 = vmatmul.mubr.msk.f32.vlgmr.msra.gmra.mrb[0].mxu0 %vm126_vm2, %v289_v19  ;;  %v454_v24 = vpop.permute.xlu0 %453 }
 0x15f   :  { %3886 = vmatpush3.xpose.msk.msra.mxu0 %vm126_vm2, %v456_v21  ;;  %3887 = vmatprep.mubr.msk.f32.mxu0 %vm4342_vm1, %v4341_v9 }
 0x160   :  { %3895 = vmatprep.subr.mxu0 %v4341_v9 }
 0x162   :  { %3888 = vmatmul.mubr.msk.f32.vlgmr.msra.gmra.mrb[2].mxu0 %vm126_vm2, %v454_v24  ;;  %v619_v25 = vpop.permute.xlu0 %618  ;;  %v802_v26 = vpop.permute.xlu1 %801 }
 0x163   :  { %3896 = vmatpush3.xpose.msk.msra.mxu0 %vm126_vm2, %v621_v23  ;;  %3897 = vmatprep.mubr.msk.f32.mxu0 %vm4342_vm1, %v4341_v9 }
 0x164   :  { %3905 = vmatprep.subr.mxu0 %v4341_v9 }
 0x166   :  { %3898 = vmatmul.mubr.msk.f32.vlgmr.msra.gmra.mrb[4].mxu0 %vm126_vm2, %v619_v25  ;;  %v967_v27 = vpop.permute.xlu0 %966  ;;  %v965_v28 = vpop.permute.xlu1 %964 }
 0x167   :  { %3906 = vmatpush3.xpose.msk.msra.mxu0 %vm126_vm2, %v802_v26  ;;  %3907 = vmatprep.mubr.msk.f32.mxu0 %vm4342_vm1, %v4341_v9 }
 0x168   :  { %3915 = vmatprep.subr.mxu0 %v4341_v9 }
 0x16a   :  { %3908 = vmatmul.mubr.msk.f32.vlgmr.msra.gmra.mrb[6].mxu0 %vm126_vm2, %v4456_v18  ;;  %v1132_v29 = vpop.permute.xlu0 %1131  ;;  %v1130_v31 = vpop.permute.xlu1 %1129 }
 0x16b   :  { %3916 = vmatpush3.xpose.msk.msra.mxu0 %vm126_vm2, %v967_v27  ;;  %3917 = vmatprep.mubr.msk.f32.mxu0 %vm4342_vm1, %v4341_v9 }
 0x16c   :  { %3925 = vmatprep.subr.mxu0 %v4341_v9 }
 0x16e   :  { %3918 = vmatmul.mubr.msk.f32.vlgmr.msra.gmra.mrb[8].mxu0 %vm126_vm2, %v965_v28  ;;  %v1297_v30 = vpop.permute.xlu0 %1296  ;;  %v1295_v33 = vpop.permute.xlu1 %1294 }
 0x16f   :  { %3926 = vmatpush3.xpose.msk.msra.mxu0 %vm126_vm2, %v1132_v29  ;;  %3927 = vmatprep.mubr.msk.f32.mxu0 %vm4342_vm1, %v4341_v9 }
 0x170   :  { %3935 = vmatprep.subr.mxu0 %v4341_v9 }
 0x172   :  { %3928 = vmatmul.mubr.msk.f32.vlgmr.msra.gmra.mrb[10].mxu0 %vm126_vm2, %v1130_v31  ;;  %v213_v32 = vpop.permute.xlu0 %212  ;;  %v4530_v58 = vpop.permute.xlu1 %377 }
 0x173   :  { %3871 = vmatpush3.msra.mxu1 %v213_v32  ;;  %3936 = vmatpush3.xpose.msk.msra.mxu0 %vm126_vm2, %v1297_v30 }
 0x174   :  { %3937 = vmatprep.mubr.msk.f32.mxu0 %vm4342_vm1, %v4341_v9  ;;  %3880 = vmatprep.subr.mxu1 %v4341_v9 }
 0x176   :  { %3938 = vmatmul.mubr.msk.f32.vlgmr.msra.gmra.mrb[12].mxu0 %vm126_vm2, %v1295_v33 }
 0x22d   :  { %v197_v34 = vpop.f32.mrb[2].mxu1 }
 0x22e   :  { %v3869_v35 = vpop.f32.mrb[3].mxu1  ;;  %v201_v36 = vsel %vm126_vm2, %v197_v34, -inf }
 0x22f   :  { %202 = vmax.xlane.f32.xlu0 %v201_v36 }
 0x231   :  { %v362_v37 = vpop.f32.mrb[0].mxu0 }
 0x232   :  { %v3879_v38 = vpop.f32.mrb[1].mxu0  ;;  %v366_v39 = vsel %vm126_vm2, %v362_v37, -inf }
 0x233   :  { %367 = vmax.xlane.f32.xlu1 %v366_v39 }
 0x235   :  { %v527_v40 = vpop.f32.mrb[2].mxu0 }
 0x236   :  { %v3889_v41 = vpop.f32.mrb[3].mxu0  ;;  %v531_v42 = vsel %vm126_vm2, %v527_v40, -inf }
 0x237   :  { %532 = vmax.xlane.f32.xlu0 %v531_v42 }
 0x239   :  { %v692_v43 = vpop.f32.mrb[4].mxu0 }
 0x23a   :  { %v3899_v44 = vpop.f32.mrb[5].mxu0  ;;  %v696_v45 = vsel %vm126_vm2, %v692_v43, -inf }
 0x23b   :  { %697 = vmax.xlane.f32.xlu0 %v696_v45 }
 0x23d   :  { %v873_v46 = vpop.f32.mrb[6].mxu0 }
 0x23e   :  { %v3909_v47 = vpop.f32.mrb[7].mxu0  ;;  %v877_v48 = vsel %vm126_vm2, %v873_v46, -inf }
 0x23f   :  { %878 = vmax.xlane.f32.xlu1 %v877_v48 }
 0x241   :  { %v1038_v49 = vpop.f32.mrb[8].mxu0 }
 0x242   :  { %v3919_v50 = vpop.f32.mrb[9].mxu0  ;;  %v1042_v51 = vsel %vm126_vm2, %v1038_v49, -inf }
 0x243   :  { %1043 = vmax.xlane.f32.xlu0 %v1042_v51 }
 0x245   :  { %v1203_v52 = vpop.f32.mrb[10].mxu0 }
 0x246   :  { %v3929_v53 = vpop.f32.mrb[11].mxu0  ;;  %v1207_v54 = vsel %vm126_vm2, %v1203_v52, -inf }
 0x247   :  { %1208 = vmax.xlane.f32.xlu1 %v1207_v54 }
 0x249   :  { %v1368_v55 = vpop.f32.mrb[12].mxu0 }
 0x24a   :  { %v3939_v56 = vpop.f32.mrb[13].mxu0  ;;  %v1372_v57 = vsel %vm126_vm2, %v1368_v55, -inf }
 0x24b   :  { %1373 = vmax.xlane.f32.xlu0 %v1372_v57 }
 0x258   :  { %707 = vrot.lane.b32.xlu1 %v4442_v17, %s4352_s11 }
 0x261   :  { %542 = vrot.lane.b32.xlu0 %v4442_v17, %s4353_s12 }
 0x2bc   :  { %v203_v59 = vpop.xlane.xlu0 %202 }
 0x2bd   :  { %v204_v60 = vsub.f32 %v197_v34, %v203_v59 }
 0x2bf   :  { %v205_v61 = vmul.f32 1.442695, %v204_v60 }
 0x2c0   :  { %v368_v62 = vpop.xlane.xlu1 %367 }
 0x2c1   :  { %4237 = vpow2.f32 %v205_v61  ;;  %v369_v63 = vsub.f32 %v362_v37, %v368_v62 }
 0x2c3   :  { %v370_v4 = vmul.f32 1.442695, %v369_v63 }
 0x2c4   :  { %v533_v7 = vpop.xlane.xlu0 %532 }
 0x2c5   :  { %4239 = vpow2.f32 %v370_v4  ;;  %v534_v10 = vsub.f32 %v527_v40, %v533_v7 }
 0x2c7   :  { %v535_v14 = vmul.f32 1.442695, %v534_v10 }
 0x2c8   :  { %v698_v15 = vpop.xlane.xlu0 %697 }
 0x2c9   :  { %4241 = vpow2.f32 %v535_v14  ;;  %v699_v16 = vsub.f32 %v692_v43, %v698_v15 }
 0x2cb   :  { %v4238_v19 = vpop.eup %4237  ;;  %v700_v20 = vmul.f32 1.442695, %v699_v16 }
 0x2cc   :  { %v207_v17 = vsel %vm126_vm2, %v4238_v19, 0.0  ;;  %v879_v27 = vpop.xlane.xlu1 %878 }
 0x2cd   :  { %4243 = vpow2.f32 %v700_v20  ;;  %208 = vadd.xlane.f32.xlu1 %v207_v17  ;;  %v880_v28 = vsub.f32 %v873_v46, %v879_v27 }
 0x2cf   :  { %v4240_v21 = vpop.eup %4239  ;;  %v881_v32 = vmul.f32 1.442695, %v880_v28 }
 0x2d0   :  { %v372_v22 = vsel %vm126_vm2, %v4240_v21, 0.0  ;;  %v1044_v29 = vpop.xlane.xlu0 %1043 }
 0x2d1   :  { %373 = vadd.xlane.f32.xlu0 %v372_v22  ;;  %v1045_v31 = vsub.f32 %v1038_v49, %v1044_v29  ;;  %4245 = vpow2.f32 %v881_v32 }
 0x2d3   :  { %v4242_v23 = vpop.eup %4241  ;;  %v1046_v35 = vmul.f32 1.442695, %v1045_v31 }
 0x2d4   :  { %v537_v24 = vsel %vm126_vm2, %v4242_v23, 0.0  ;;  %v1209_v30 = vpop.xlane.xlu1 %1208 }
 0x2d5   :  { %538 = vadd.xlane.f32.xlu1 %v537_v24  ;;  %v1210_v33 = vsub.f32 %v1203_v52, %v1209_v30  ;;  %4247 = vpow2.f32 %v1046_v35  ;;  %v4222_v24 = vpack.i.bf16 %v4407_v5, %v4398_v2 }
 0x2d7   :  { %v4535_v25 = vpop.eup %4243  ;;  %v1211_v36 = vmul.f32 1.442695, %v1210_v33 }
 0x2d8   :  { %v702_v26 = vsel %vm126_vm2, %v4535_v25, 0.0  ;;  %v1374_v34 = vpop.xlane.xlu0 %1373  ;;  %v708_v47 = vpop.permute.xlu1 %707 }
 0x2d9   :  { %703 = vadd.xlane.f32.xlu0 %v702_v26  ;;  %v1375_v37 = vsub.f32 %v1368_v55, %v1374_v34  ;;  %4249 = vpow2.f32 %v1211_v36 }
 0x2db   :  { %v1376_v38 = vmul.f32 1.442695, %v1375_v37  ;;  %v4246_v39 = vpop.eup %4245 }
 0x2dc   :  { %v883_v41 = vsel %vm126_vm2, %v4246_v39, 0.0  ;;  %v543_v48 = vpop.permute.xlu0 %542 }
 0x2dd   :  { %4251 = vpow2.f32 %v1376_v38 }
 0x2df   :  { %v4543_v40 = vpop.eup %4247 }
 0x2e0   :  { %v1048_v44 = vsel %vm126_vm2, %v4543_v40, 0.0 }
 0x2e3   :  { %v4546_v42 = vpop.eup %4249 }
 0x2e4   :  { %v1213_v43 = vsel %vm126_vm2, %v4546_v42, 0.0 }
 0x2e6   :  { %1053 = vrot.lane.b32.xlu1 %v4456_v18, %s4350_s9 }
 0x2e7   :  { %v4552_v45 = vpop.eup %4251 }
 0x2e8   :  { %v1378_v46 = vsel %vm126_vm2, %v4552_v45, 0.0 }
 0x2ef   :  { %888 = vrot.lane.b32.xlu0 %v4456_v18, %s4351_s10 }
 0x30a   :  { %884 = vadd.xlane.f32.xlu1 %v883_v41 }
 0x30e   :  { %1214 = vadd.xlane.f32.xlu1 %v1213_v43  ;;  %1049 = vadd.xlane.f32.xlu0 %v1048_v44 }
 0x312   :  { %1379 = vadd.xlane.f32.xlu1 %v1378_v46 }
 0x323   :  { %1383 = vrot.lane.b32.xlu1 %v4456_v18, %s4352_s11 }
 0x324   :  { %1218 = vrot.lane.b32.xlu0 %v4456_v18, %s4353_s12 }
 0x327   :  { %4223 = vrot.lane.b32.xlu1 %v4222_v24, %s4354_s13  ;;  %v25_v24 = vld [vmem:[%s4996_s1 + $0x28] sm:$0xff] }
 0x328   :  { %4218 = vrot.lane.b32.xlu0 %v4217_v3, %s4354_s13 }
 0x35a   :  { %v209_v49 = vpop.xlane.xlu1 %208 }
 0x35b   :  { %4253 = vrcp.f32 %v209_v49 }
 0x35e   :  { %v374_v50 = vpop.xlane.xlu0 %373 }
 0x35f   :  { %4255 = vrcp.f32 %v374_v50 }
 0x362   :  { %v539_v51 = vpop.xlane.xlu1 %538 }
 0x363   :  { %4257 = vrcp.f32 %v539_v51 }
 0x365   :  { %v4254_v52 = vpop.eup %4253 }
 0x366   :  { %v211_v53 = vmul.f32 %v4254_v52, %v4238_v19  ;;  %v704_v54 = vpop.xlane.xlu0 %703  ;;  %v1054_v61 = vpop.permute.xlu1 %1053 }
 0x367   :  { %4259 = vrcp.f32 %v704_v54 }
 0x368   :  { %3873 = vmatmul.mubr.msk.f32.vlgmr.msra.gmra.mrb[4].mxu1 %vm126_vm2, %v211_v53 }
 0x369   :  { %v4256_v55 = vpop.eup %4255  ;;  %3881 = vmatpush3.msra.mxu1 %v4530_v58  ;;  %3882 = vmatprep.mubr.msk.f32.mxu1 %vm4342_vm1, %v4341_v9 }
 0x36a   :  { %v376_v18 = vmul.f32 %v4256_v55, %v4240_v21  ;;  %3890 = vmatprep.subr.mxu1 %v4341_v9  ;;  %v889_v60 = vpop.permute.xlu0 %888 }
 0x36c   :  { %3883 = vmatmul.mubr.msk.f32.vlgmr.msra.gmra.mrb[6].mxu1 %vm126_vm2, %v376_v18  ;;  %v1476_v18 = vsub.s32 1, %v4427_v11 }
 0x36d   :  { %v4258_v56 = vpop.eup %4257  ;;  %3891 = vmatpush3.msra.mxu1 %v543_v48  ;;  %3892 = vmatprep.mubr.msk.f32.mxu1 %vm4342_vm1, %v4341_v9 }
 0x36e   :  { %v541_v57 = vmul.f32 %v4258_v56, %v4242_v23  ;;  %3900 = vmatprep.subr.mxu1 %v4341_v9  ;;  %v1477_v56 = vrot.slane %v4437_v13, %v1476_v18 }
 0x370   :  { %3893 = vmatmul.mubr.msk.f32.vlgmr.msra.gmra.mrb[8].mxu1 %vm126_vm2, %v541_v57 }
 0x371   :  { %v4260_v59 = vpop.eup %4259  ;;  %3901 = vmatpush3.msra.mxu1 %v708_v47  ;;  %3902 = vmatprep.mubr.msk.f32.mxu1 %vm4342_vm1, %v4341_v9 }
 0x372   :  { %v706_v58 = vmul.f32 %v4260_v59, %v4535_v25  ;;  %3910 = vmatprep.subr.mxu1 %v4341_v9 }
 0x374   :  { %3903 = vmatmul.mubr.msk.f32.vlgmr.msra.gmra.mrb[10].mxu1 %vm126_vm2, %v706_v58 }
 0x375   :  { %3911 = vmatpush3.msra.mxu1 %v889_v60  ;;  %3912 = vmatprep.mubr.msk.f32.mxu1 %vm4342_vm1, %v4341_v9 }
 0x376   :  { %3920 = vmatprep.subr.mxu1 %v4341_v9 }
 0x397   :  { %v885_v62 = vpop.xlane.xlu1 %884 }
 0x398   :  { %4261 = vrcp.f32 %v885_v62 }
 0x39b   :  { %v1215_v63 = vpop.xlane.xlu1 %1214  ;;  %v1050_v4 = vpop.xlane.xlu0 %1049 }
 0x39c   :  { %4263 = vrcp.f32 %v1050_v4 }
 0x39d   :  { %4265 = vrcp.f32 %v1215_v63 }
 0x39f   :  { %v1380_v7 = vpop.xlane.xlu1 %1379  ;;  %v1219_v20 = vpop.permute.xlu0 %1218 }
 0x3a0   :  { %4267 = vrcp.f32 %v1380_v7 }
 0x3a2   :  { %v4262_v10 = vpop.eup %4261 }
 0x3a3   :  { %v887_v14 = vmul.f32 %v4262_v10, %v4246_v39  ;;  %v1384_v22 = vpop.permute.xlu1 %1383  ;;  %v4219_v25 = vpop.permute.xlu0 %4218 }
 0x3a4   :  { %v4221_v26 = vunpack.i.h.bf16 %v4219_v25  ;;  %v4220_v27 = vunpack.i.l.bf16 %v4219_v25  ;;  %v27_v25 = vld [vmem:[%s4996_s1 + $0x38] sm:$0xff] }
 0x3a5   :  { %3913 = vmatmul.mubr.msk.f32.vlgmr.msra.gmra.mrb[12].mxu1 %vm126_vm2, %v887_v14 }
 0x3a6   :  { %3921 = vmatpush3.msra.mxu1 %v1054_v61  ;;  %3922 = vmatprep.mubr.msk.f32.mxu1 %vm4342_vm1, %v4341_v9  ;;  %v4264_v15 = vpop.eup %4263  ;;  %v4126_v28 = vpack.c.bf16 %v4221_v26, %v4220_v27  ;;  %v4138_v26 = vpack.c.bf16 %v27_v25, %v25_v24  ;;  %v28_v27 = vld [vmem:[%s4997_s2] sm:$0xff] }
 0x3a7   :  { %3930 = vmatprep.subr.mxu1 %v4341_v9  ;;  %v1052_v16 = vmul.f32 %v4264_v15, %v4543_v40  ;;  %v4266_v19 = vpop.eup %4265  ;;  %v4224_v29 = vpop.permute.xlu1 %4223 }
 0x3a8   :  { %v1217_v17 = vmul.f32 %v4266_v19, %v4546_v42  ;;  %v4226_v30 = vunpack.i.h.bf16 %v4224_v29  ;;  %v4225_v31 = vunpack.i.l.bf16 %v4224_v29  ;;  %4127 = vmatprep.subr.bf16.mxu0 %v4126_v28  ;;  %v30_v29 = vld [vmem:[%s4997_s2 + $0x10] sm:$0xff] }
 0x3a9   :  { %3923 = vmatmul.mubr.msk.f32.vlgmr.msra.gmra.mrb[14].mxu1 %vm126_vm2, %v1052_v16  ;;  %4129 = vmatpush3.bf16.msra.mxu0 %v4126_v28  ;;  %v29_v28 = vld [vmem:[%s4997_s2 + $0x8] sm:$0xff] }
 0x3aa   :  { %3931 = vmatpush3.msra.mxu1 %v1219_v20  ;;  %3932 = vmatprep.mubr.msk.f32.mxu1 %vm4342_vm1, %v4341_v9  ;;  %v4268_v21 = vpop.eup %4267  ;;  %v4130_v32 = vpack.c.bf16 %v4226_v30, %v4225_v31  ;;  %v4142_v30 = vpack.c.bf16 %v29_v28, %v28_v27  ;;  %v31_v31 = vld [vmem:[%s4997_s2 + $0x18] sm:$0xff]  ;;  %v4695_v27 = vld [vmem:[%s4996_s1 + $0x50] sm:$0xff] }
 0x3ab   :  { %3940 = vmatprep.subr.mxu1 %v4341_v9  ;;  %v1382_v23 = vmul.f32 %v4268_v21, %v4552_v45 }
 0x3ac   :  { %4131 = vmatprep.subr.bf16.mxu0 %v4130_v32 }
 0x3ad   :  { %3933 = vmatmul.mubr.msk.f32.vlgmr.msra.gmra.mrb[16].mxu1 %vm126_vm2, %v1217_v17  ;;  %4133 = vmatpush3.bf16.msra.mxu0 %v4130_v32  ;;  %v4146_v32 = vpack.c.bf16 %v31_v31, %v30_v29  ;;  %v4702_v29 = vld [vmem:[%s4996_s1 + $0x60] sm:$0xff] }
 0x3ae   :  { %3941 = vmatpush3.msra.mxu1 %v1384_v22  ;;  %3942 = vmatprep.mubr.msk.f32.mxu1 %vm4342_vm1, %v4341_v9  ;;  %v23_v22 = vld [vmem:[%s4996_s1 + $0x18] sm:$0xff] }
 0x3af   :  { %4143 = vmatprep.subr.bf16.mxu0 %v4142_v30 }
 0x3b1   :  { %3943 = vmatmul.mubr.msk.f32.vlgmr.msra.gmra.mrb[18].mxu1 %vm126_vm2, %v1382_v23 }
 0x43b   :  { %v284_v33 = vpop.f32.mrb[4].mxu1 }
 0x43c   :  { %v3874_v0 = vpop.f32.mrb[5].mxu1 }
 0x43d   :  { %v33_v0 = vld [vmem:[%s4997_s2 + $0x28] sm:$0xff] }
 0x43f   :  { %v449_v1 = vpop.f32.mrb[6].mxu1 }
 0x440   :  { %784 = vrot.lane.b32.xlu0 %v449_v1, %s4355_s14  ;;  %v3884_v2 = vpop.f32.mrb[7].mxu1 }
 0x443   :  { %v614_v3 = vpop.f32.mrb[8].mxu1 }
 0x444   :  { %788 = vrot.lane.b32.xlu1 %v614_v3, %s4356_s15  ;;  %v3894_v5 = vpop.f32.mrb[9].mxu1 }
 0x447   :  { %v779_v34 = vpop.f32.mrb[10].mxu1 }
 0x448   :  { %792 = vrot.lane.b32.xlu1 %v779_v34, %s4357_s16  ;;  %v3904_v35 = vpop.f32.mrb[11].mxu1 }
 0x478   :  { %v960_v36 = vpop.f32.mrb[12].mxu1 }
 0x479   :  { %v3914_v37 = vpop.f32.mrb[13].mxu1 }
 0x47a   :  { %v1606_v37 = vsub.s32 4, %v4427_v11 }
 0x47c   :  { %v1125_v38 = vpop.f32.mrb[14].mxu1 }
 0x47d   :  { %1460 = vrot.lane.b32.xlu0 %v1125_v38, %s4355_s14  ;;  %v3924_v39 = vpop.f32.mrb[15].mxu1  ;;  %v1612_v38 = vsub.s32 5, %v4427_v11 }
 0x47e   :  { %v1607_v39 = vrot.slane %v4437_v13, %v1606_v37 }
 0x480   :  { %v1290_v40 = vpop.f32.mrb[16].mxu1 }
 0x481   :  { %1464 = vrot.lane.b32.xlu0 %v1290_v40, %s4356_s15  ;;  %v3934_v41 = vpop.f32.mrb[17].mxu1 }
 0x484   :  { %v1455_v42 = vpop.f32.mrb[18].mxu1 }
 0x485   :  { %1468 = vrot.lane.b32.xlu1 %v1455_v42, %s4357_s16  ;;  %v3944_v43 = vpop.f32.mrb[19].mxu1  ;;  %v1613_v42 = vrot.slane %v4437_v13, %v1612_v38 }
 0x4b2   :  { %v785_v44 = vpop.permute.xlu0 %784 }
 0x4b3   :  { %v795_v46 = vsel %vm126_vm2, %v284_v33, %v785_v44  ;;  %v32_v33 = vld [vmem:[%s4997_s2 + $0x20] sm:$0xff] }
 0x4b4   :  { %v4150_v1 = vpack.c.bf16 %v33_v0, %v32_v33 }
 0x4b6   :  { %v789_v45 = vpop.permute.xlu1 %788 }
 0x4b7   :  { %v797_v47 = vsel %vm796_vm3, %v795_v46, %v789_v45 }
 0x4ba   :  { %v793_v48 = vpop.permute.xlu1 %792 }
 0x4bb   :  { %v799_v49 = vsel %vm798_vm4, %v797_v47, %v793_v48 }
 0x4bc   :  { %3953 = vmatprep.mubr.msk.f32.mxu0 %vm41_vm0, %v799_v49  ;;  %v34_v49 = vld [vmem:[%s4997_s2 + $0x30] sm:$0xff] }
 0x4ef   :  { %v1461_v50 = vpop.permute.xlu0 %1460 }
 0x4f0   :  { %v1471_v52 = vsel %vm126_vm2, %v960_v36, %v1461_v50  ;;  %v35_v50 = vld [vmem:[%s4997_s2 + $0x38] sm:$0xff] }
 0x4f3   :  { %v1465_v51 = vpop.permute.xlu0 %1464 }
 0x4f4   :  { %v1472_v53 = vsel %vm796_vm3, %v1471_v52, %v1465_v51  ;;  %v4154_v51 = vpack.c.bf16 %v35_v50, %v34_v49  ;;  %v1618_v52 = vsub.s32 2, %v4427_v11 }
 0x4f7   :  { %v1469_v54 = vpop.permute.xlu1 %1468 }
 0x4f8   :  { %v1473_v55 = vsel %vm798_vm4, %v1472_v53, %v1469_v54  ;;  %v1619_v53 = vrot.slane %v4437_v13, %v1618_v52 }
 0x4f9   :  { %3954 = vmatmul.mubr.msk.f32.vlgmr.msra.gmra.mrb[14].mxu0 %vm41_vm0, %v1473_v55 }
 0x4fa   :  { %4145 = vmatpush3.bf16.msra.mxu0 %v4142_v30  ;;  %v4707_v30 = vld [vmem:[%s4996_s1 + $0x70] sm:$0xff] }
 0x4fb   :  { %4147 = vmatprep.subr.bf16.mxu0 %v4146_v32  ;;  %v4162_v31 = vpack.c.bf16 %v4707_v30, %v4702_v29 }
 0x4fe   :  { %4149 = vmatpush3.bf16.msra.mxu0 %v4146_v32 }
 0x4ff   :  { %4151 = vmatprep.subr.bf16.mxu0 %v4150_v1 }
 0x502   :  { %4153 = vmatpush3.bf16.msra.mxu0 %v4150_v1 }
 0x503   :  { %4155 = vmatprep.subr.bf16.mxu0 %v4154_v51 }
 0x506   :  { %4157 = vmatpush3.bf16.msra.mxu0 %v4154_v51 }
 0x507   :  { %4007 = vmatprep.subr.mxu0 %v4341_v9 }
 0x5cc   :  { %v3955_v57 = vpop.f32.mrb[14].mxu0 }
 0x5cd   :  { %v1572_v59 = vadd.f32 %v3955_v57, %v1477_v56  ;;  %v1566_v58 = vpop.f32.mrb[15].mxu0 }
 0x5ce   :  { %v1567_v60 = vadd.f32 %v1566_v58, %v1477_v56 }
 0x5cf   :  { %v1576_v61 = vadd.f32 %v1572_v59, %v4421_v8 }
 0x5d0   :  { %v1575_v62 = vadd.f32 %v1567_v60, %v4412_v6  ;;  %v21_v6 = vld [vmem:[%s4996_s1 + $0x8] sm:$0xff]  ;;  %v1705_v60 = vsub.s32 3, %v4427_v11 }
 0x5d1   :  { %v1580_v63 = vsel %vm41_vm0, %v1576_v61, 0.0  ;;  %v4134_v23 = vpack.c.bf16 %v23_v22, %v21_v6 }
 0x5d2   :  { %1581 = vadd.xlane.f32.xlu1 %v1580_v63  ;;  %v1577_v4 = vsel %vm41_vm0, %v1575_v62, 0.0 }
 0x5d3   :  { %1578 = vadd.xlane.f32.xlu0 %v1577_v4  ;;  %4135 = vmatprep.subr.bf16.mxu1 %v4134_v23 }
 0x5d4   :  { %4137 = vmatpush3.bf16.msra.mxu1 %v4134_v23 }
 0x5d5   :  { %4139 = vmatprep.subr.bf16.mxu1 %v4138_v26 }
 0x5d8   :  { %4141 = vmatpush3.bf16.msra.mxu1 %v4138_v26  ;;  %v4690_v26 = vld [vmem:[%s4996_s1 + $0x40] sm:$0xff] }
 0x5d9   :  { %v4158_v28 = vpack.c.bf16 %v4695_v27, %v4690_v26 }
 0x5db   :  { %4159 = vmatprep.subr.bf16.mxu1 %v4158_v28 }
 0x65f   :  { %v1582_v7 = vpop.xlane.xlu1 %1581 }
 0x660   :  { %v1585_v10 = vmul.f32 0.03125, %v1582_v7  ;;  %v1579_v14 = vpop.xlane.xlu0 %1578 }
 0x661   :  { %v1584_v15 = vmul.f32 0.03125, %v1579_v14 }
 0x662   :  { %v1587_v16 = vsub.f32 %v1576_v61, %v1585_v10  ;;  %v1706_v61 = vrot.slane %v4437_v13, %v1705_v60 }
 0x663   :  { %v1586_v19 = vsub.f32 %v1575_v62, %v1584_v15 }
 0x664   :  { %v1589_v21 = vmul.f32 %v1587_v16, %v1587_v16 }
 0x665   :  { %v1588_v20 = vmul.f32 %v1586_v19, %v1586_v19 }
 0x666   :  { %v1593_v8 = vsel %vm41_vm0, %v1589_v21, 0.0 }
 0x667   :  { %v1590_v17 = vsel %vm41_vm0, %v1588_v20, 0.0 }
 0x668   :  { %1591 = vadd.xlane.f32.xlu0 %v1590_v17 }
 0x66c   :  { %1594 = vadd.xlane.f32.xlu0 %v1593_v8 }
 0x6f5   :  { %v1592_v2 = vpop.xlane.xlu0 %1591 }
 0x6f6   :  { %v1596_v3 = vmul.f32 0.03125, %v1592_v2 }
 0x6f8   :  { %v1598_v5 = vadd.f32 1e-05, %v1596_v3 }
 0x6f9   :  { %v1595_v34 = vpop.xlane.xlu0 %1594 }
 0x6fa   :  { %4269 = vrsqrt.f32 %v1598_v5  ;;  %v1597_v35 = vmul.f32 0.03125, %v1595_v34  ;;  %v1819_v5 = vsub.s32 6, %v4427_v11  ;;  %v1825_v34 = vsub.s32 7, %v4427_v11 }
 0x6fc   :  { %v1599_v36 = vadd.f32 1e-05, %v1597_v35  ;;  %v1820_v35 = vrot.slane %v4437_v13, %v1819_v5 }
 0x6fe   :  { %4271 = vrsqrt.f32 %v1599_v36 }
 0x704   :  { %v4270_v40 = vpop.eup %4269 }
 0x705   :  { %v1602_v41 = vmul.f32 %v4270_v40, %v1586_v19 }
 0x707   :  { %v1608_v43 = vmul.f32 %v1607_v39, %v1602_v41 }
 0x708   :  { %v4272_v44 = vpop.eup %4271 }
 0x709   :  { %v1603_v45 = vmul.f32 %v4272_v44, %v1587_v16  ;;  %v1614_v46 = vadd.f32 %v1613_v42, %v1608_v43 }
 0x70b   :  { %v1609_v47 = vmul.f32 %v1607_v39, %v1603_v45  ;;  %3964 = vmatprep.mubr.msk.f32.mxu1 %vm41_vm0, %v1614_v46 }
 0x70d   :  { %v1615_v48 = vadd.f32 %v1613_v42, %v1609_v47  ;;  %v1826_v42 = vrot.slane %v4437_v13, %v1825_v34  ;;  %v4733_v47 = vld [vmem:[%s4998_s3 + $0x8] sm:$0xff] }
 0x70e   :  { %v1852_v13 = vrot.slane %v4733_v47, %v39_v12 }
 0x70f   :  { %3965 = vmatmul.mubr.msk.f32.vlgmr.msra.gmra.mrb[20].mxu1 %vm41_vm0, %v1615_v48 }
 0x710   :  { %4161 = vmatpush3.bf16.msra.mxu1 %v4158_v28 }
 0x711   :  { %4163 = vmatprep.subr.bf16.mxu1 %v4162_v31 }
 0x714   :  { %4165 = vmatpush3.bf16.msra.mxu1 %v4162_v31 }
 0x715   :  { %3997 = vmatprep.subr.mxu1 %v4341_v9 }
 0x7e2   :  { %v3966_v54 = vpop.f32.mrb[20].mxu1 }
 0x7e3   :  { %v1698_v55 = vadd.f32 %v3966_v54, %v1619_v53  ;;  %v1692_v56 = vpop.f32.mrb[21].mxu1 }
 0x7e4   :  { %v1693_v57 = vadd.f32 %v1692_v56, %v1619_v53 }
 0x7e5   :  { %v1702_v58 = vmax.f32 %v1698_v55, 0.0 }
 0x7e6   :  { %v1701_v59 = vmax.f32 %v1693_v57, 0.0 }
 0x7e8   :  { %3983 = vmatprep.mubr.msk.f32.mxu0 %vm1707_vm5, %v1701_v59 }
 0x7e9   :  { %3984 = vmatmul.mubr.msk.f32.vlgmr.msra.gmra.mrb[16].mxu0 %vm1707_vm5, %v1702_v58 }
 0x7ea   :  { %4009 = vmatprep.mubr.msk.f32.mxu0 %vm4342_vm1, %v4341_v9 }
 0x8bc   :  { %v3985_v62 = vpop.f32.mrb[16].mxu0 }
 0x8bd   :  { %v1786_v63 = vadd.f32 %v3985_v62, %v1706_v61  ;;  %v1780_v4 = vpop.f32.mrb[17].mxu0 }
 0x8be   :  { %v1781_v7 = vadd.f32 %v1780_v4, %v1706_v61 }
 0x8bf   :  { %v1790_v10 = vadd.f32 %v1786_v63, %v1615_v48 }
 0x8c0   :  { %v1789_v14 = vadd.f32 %v1781_v7, %v1614_v46 }
 0x8c1   :  { %v1794_v15 = vsel %vm41_vm0, %v1790_v10, 0.0 }
 0x8c2   :  { %1795 = vadd.xlane.f32.xlu0 %v1794_v15  ;;  %v1791_v16 = vsel %vm41_vm0, %v1789_v14, 0.0 }
 0x8c3   :  { %1792 = vadd.xlane.f32.xlu1 %v1791_v16 }
 0x94f   :  { %v1796_v19 = vpop.xlane.xlu0 %1795 }
 0x950   :  { %v1798_v20 = vmul.f32 0.03125, %v1796_v19  ;;  %v1793_v17 = vpop.xlane.xlu1 %1792 }
 0x951   :  { %v1797_v21 = vmul.f32 0.03125, %v1793_v17 }
 0x952   :  { %v1800_v8 = vsub.f32 %v1790_v10, %v1798_v20 }
 0x953   :  { %v1799_v6 = vsub.f32 %v1789_v14, %v1797_v21 }
 0x954   :  { %v1802_v22 = vmul.f32 %v1800_v8, %v1800_v8 }
 0x955   :  { %v1801_v23 = vmul.f32 %v1799_v6, %v1799_v6 }
 0x956   :  { %v1806_v24 = vsel %vm41_vm0, %v1802_v22, 0.0 }
 0x957   :  { %1807 = vadd.xlane.f32.xlu0 %v1806_v24  ;;  %v1803_v25 = vsel %vm41_vm0, %v1801_v23, 0.0 }
 0x958   :  { %1804 = vadd.xlane.f32.xlu1 %v1803_v25 }
 0x9e4   :  { %v1808_v32 = vpop.xlane.xlu0 %1807 }
 0x9e5   :  { %v1810_v33 = vmul.f32 0.03125, %v1808_v32  ;;  %v1805_v0 = vpop.xlane.xlu1 %1804 }
 0x9e6   :  { %v1809_v1 = vmul.f32 0.03125, %v1805_v0 }
 0x9e7   :  { %v1812_v2 = vadd.f32 1e-05, %v1810_v33 }
 0x9e8   :  { %v1811_v3 = vadd.f32 1e-05, %v1809_v1 }
 0x9e9   :  { %4273 = vrsqrt.f32 %v1812_v2 }
 0x9ea   :  { %4275 = vrsqrt.f32 %v1811_v3 }
 0x9f3   :  { %v4274_v36 = vpop.eup %4273 }
 0x9f4   :  { %v4276_v39 = vpop.eup %4275  ;;  %v1816_v40 = vmul.f32 %v4274_v36, %v1800_v8 }
 0x9f5   :  { %v1815_v41 = vmul.f32 %v4276_v39, %v1799_v6 }
 0x9f6   :  { %v1822_v43 = vmul.f32 %v1820_v35, %v1816_v40 }
 0x9f7   :  { %v1821_v44 = vmul.f32 %v1820_v35, %v1815_v41 }
 0x9f8   :  { %v4722_v46 = vadd.f32 %v1826_v42, %v1822_v43 }
 0x9f9   :  { %v4720_v45 = vadd.f32 %v1826_v42, %v1821_v44 }
 0x9fb   :  { %3994 = vmatprep.mubr.msk.f32.mxu1 %vm41_vm0, %v4720_v45 }
 0x9fc   :  { %3995 = vmatmul.mubr.msk.f32.vlgmr.msra.gmra.mrb[22].mxu1 %vm41_vm0, %v4722_v46 }
 0x9fd   :  { %3999 = vmatprep.mubr.msk.f32.mxu1 %vm4342_vm1, %v4341_v9 }
 0xacf   :  { %v3996_v48 = vpop.f32.mrb[22].mxu1 }
 0xad0   :  { %v1925_v49 = vpop.f32.mrb[23].mxu1  ;;  %v4752_v12 = vadd.f32 %v3996_v48, %v1852_v13 }
 0xad1   :  { %v4738_v50 = vadd.f32 %v1925_v49, %v1852_v13 }
 0xad3   :  { %2100 = vrot.lane.b32.xlu0 %v4738_v50, %s4346_s5  ;;  %1935 = vrot.lane.b32.xlu1 %v4738_v50, %s4344_s29 }
 0xad7   :  { %2263 = vrot.lane.b32.xlu0 %v4738_v50, %s4348_s7  ;;  %2098 = vrot.lane.b32.xlu1 %v4738_v50, %s4343_s28 }
 0xadb   :  { %2428 = vrot.lane.b32.xlu0 %v4738_v50, %s4349_s8  ;;  %2265 = vrot.lane.b32.xlu1 %v4738_v50, %s4345_s30 }
 0xadf   :  { %2774 = vrot.lane.b32.xlu0 %v4752_v12, %s4346_s5  ;;  %2430 = vrot.lane.b32.xlu1 %v4738_v50, %s4347_s6 }
 0xae3   :  { %2939 = vrot.lane.b32.xlu0 %v4752_v12, %s4345_s30  ;;  %2609 = vrot.lane.b32.xlu1 %v4752_v12, %s4344_s29 }
 0xae7   :  { %3104 = vrot.lane.b32.xlu0 %v4752_v12, %s4347_s6  ;;  %2772 = vrot.lane.b32.xlu1 %v4752_v12, %s4343_s28 }
 0xaeb   :  { %2022 = vrot.lane.b32.xlu0 %v4738_v50, %s4351_s10  ;;  %2937 = vrot.lane.b32.xlu1 %v4752_v12, %s4348_s7 }
 0xaef   :  { %3102 = vrot.lane.b32.xlu1 %v4752_v12, %s4349_s8 }
 0xaf3   :  { %2187 = vrot.lane.b32.xlu1 %v4738_v50, %s4350_s9 }
 0xb45   :  { %v2101_v51 = vpop.permute.xlu0 %2100  ;;  %v1936_v53 = vpop.permute.xlu1 %1935 }
 0xb46   :  { %3998 = vmatpush3.xpose.msk.msra.mxu1 %vm126_vm2, %v1936_v53  ;;  %4008 = vmatpush3.xpose.msk.msra.mxu0 %vm126_vm2, %v2101_v51 }
 0xb47   :  { %4017 = vmatprep.subr.mxu0 %v4341_v9  ;;  %4002 = vmatprep.subr.mxu1 %v4341_v9 }
 0xb49   :  { %v2264_v54 = vpop.permute.xlu0 %2263  ;;  %4000 = vmatmul.mubr.msk.f32.vlgmr.msra.gmra.mrb[24].mxu1 %vm126_vm2, %v4738_v50  ;;  %v2099_v55 = vpop.permute.xlu1 %2098 }
 0xb4a   :  { %4010 = vmatmul.mubr.msk.f32.vlgmr.msra.gmra.mrb[18].mxu0 %vm126_vm2, %v2099_v55  ;;  %4004 = vmatprep.mubr.msk.f32.mxu1 %vm4342_vm1, %v4341_v9 }
 0xb4b   :  { %4019 = vmatprep.mubr.msk.f32.mxu0 %vm4342_vm1, %v4341_v9 }
 0xb4d   :  { %v2429_v56 = vpop.permute.xlu0 %2428  ;;  %v2266_v57 = vpop.permute.xlu1 %2265 }
 0xb4e   :  { %4018 = vmatpush3.xpose.msk.msra.mxu0 %vm126_vm2, %v2266_v57 }
 0xb4f   :  { %4027 = vmatprep.subr.mxu0 %v4341_v9 }
 0xb51   :  { %v2775_v59 = vpop.permute.xlu0 %2774  ;;  %4020 = vmatmul.mubr.msk.f32.vlgmr.msra.gmra.mrb[20].mxu0 %vm126_vm2, %v2264_v54  ;;  %v2431_v58 = vpop.permute.xlu1 %2430 }
 0xb52   :  { %4028 = vmatpush3.xpose.msk.msra.mxu0 %vm126_vm2, %v2431_v58  ;;  %4029 = vmatprep.mubr.msk.f32.mxu0 %vm4342_vm1, %v4341_v9 }
 0xb53   :  { %4037 = vmatprep.subr.mxu0 %v4341_v9 }
 0xb55   :  { %v2940_v61 = vpop.permute.xlu0 %2939  ;;  %4030 = vmatmul.mubr.msk.f32.vlgmr.msra.gmra.mrb[22].mxu0 %vm126_vm2, %v2429_v56  ;;  %v2610_v62 = vpop.permute.xlu1 %2609 }
 0xb56   :  { %4038 = vmatpush3.xpose.msk.msra.mxu0 %vm126_vm2, %v2610_v62  ;;  %4039 = vmatprep.mubr.msk.f32.mxu0 %vm4342_vm1, %v4341_v9 }
 0xb57   :  { %4047 = vmatprep.subr.mxu0 %v4341_v9 }
 0xb59   :  { %v3105_v63 = vpop.permute.xlu0 %3104  ;;  %4040 = vmatmul.mubr.msk.f32.vlgmr.msra.gmra.mrb[24].mxu0 %vm126_vm2, %v4752_v12  ;;  %v2773_v4 = vpop.permute.xlu1 %2772 }
 0xb5a   :  { %4048 = vmatpush3.xpose.msk.msra.mxu0 %vm126_vm2, %v2775_v59  ;;  %4049 = vmatprep.mubr.msk.f32.mxu0 %vm4342_vm1, %v4341_v9 }
 0xb5b   :  { %4057 = vmatprep.subr.mxu0 %v4341_v9 }
 0xb5d   :  { %v2023_v7 = vpop.permute.xlu0 %2022  ;;  %4050 = vmatmul.mubr.msk.f32.vlgmr.msra.gmra.mrb[26].mxu0 %vm126_vm2, %v2773_v4  ;;  %v2938_v10 = vpop.permute.xlu1 %2937 }
 0xb5e   :  { %4003 = vmatpush3.msra.mxu1 %v2023_v7  ;;  %4058 = vmatpush3.xpose.msk.msra.mxu0 %vm126_vm2, %v2940_v61 }
 0xb5f   :  { %4059 = vmatprep.mubr.msk.f32.mxu0 %vm4342_vm1, %v4341_v9  ;;  %4067 = vmatprep.subr.mxu0 %v4341_v9 }
 0xb60   :  { %4012 = vmatprep.subr.mxu1 %v4341_v9 }
 0xb61   :  { %4060 = vmatmul.mubr.msk.f32.vlgmr.msra.gmra.mrb[28].mxu0 %vm126_vm2, %v2938_v10  ;;  %v3103_v14 = vpop.permute.xlu1 %3102 }
 0xb62   :  { %4068 = vmatpush3.xpose.msk.msra.mxu0 %vm126_vm2, %v3105_v63  ;;  %4069 = vmatprep.mubr.msk.f32.mxu0 %vm4342_vm1, %v4341_v9 }
 0xb65   :  { %4070 = vmatmul.mubr.msk.f32.vlgmr.msra.gmra.mrb[30].mxu0 %vm126_vm2, %v3103_v14  ;;  %v4826_v41 = vpop.permute.xlu1 %2187 }
 0xc1c   :  { %v2007_v15 = vpop.f32.mrb[24].mxu1 }
 0xc1d   :  { %v4001_v16 = vpop.f32.mrb[25].mxu1  ;;  %v2172_v19 = vpop.f32.mrb[18].mxu0  ;;  %v2011_v20 = vsel %vm126_vm2, %v2007_v15, -inf }
 0xc1e   :  { %2012 = vmax.xlane.f32.xlu0 %v2011_v20  ;;  %v4011_v17 = vpop.f32.mrb[19].mxu0  ;;  %v2176_v21 = vsel %vm126_vm2, %v2172_v19, -inf }
 0xc1f   :  { %2177 = vmax.xlane.f32.xlu1 %v2176_v21 }
 0xc24   :  { %v2337_v8 = vpop.f32.mrb[20].mxu0 }
 0xc25   :  { %v4021_v6 = vpop.f32.mrb[21].mxu0  ;;  %v2341_v22 = vsel %vm126_vm2, %v2337_v8, -inf }
 0xc26   :  { %2342 = vmax.xlane.f32.xlu0 %v2341_v22 }
 0xc28   :  { %v2502_v23 = vpop.f32.mrb[22].mxu0 }
 0xc29   :  { %v4031_v24 = vpop.f32.mrb[23].mxu0  ;;  %v2506_v25 = vsel %vm126_vm2, %v2502_v23, -inf }
 0xc2a   :  { %2507 = vmax.xlane.f32.xlu0 %v2506_v25 }
 0xc2c   :  { %v2681_v28 = vpop.f32.mrb[24].mxu0 }
 0xc2d   :  { %v4041_v31 = vpop.f32.mrb[25].mxu0  ;;  %v2685_v32 = vsel %vm126_vm2, %v2681_v28, -inf }
 0xc2e   :  { %2686 = vmax.xlane.f32.xlu1 %v2685_v32 }
 0xc30   :  { %v2846_v33 = vpop.f32.mrb[26].mxu0 }
 0xc31   :  { %v4051_v0 = vpop.f32.mrb[27].mxu0  ;;  %v2850_v1 = vsel %vm126_vm2, %v2846_v33, -inf }
 0xc32   :  { %2851 = vmax.xlane.f32.xlu0 %v2850_v1 }
 0xc34   :  { %v3011_v2 = vpop.f32.mrb[28].mxu0 }
 0xc35   :  { %v4061_v3 = vpop.f32.mrb[29].mxu0  ;;  %v3015_v35 = vsel %vm126_vm2, %v3011_v2, -inf }
 0xc36   :  { %3016 = vmax.xlane.f32.xlu1 %v3015_v35 }
 0xc38   :  { %v3176_v36 = vpop.f32.mrb[30].mxu0 }
 0xc39   :  { %v4071_v39 = vpop.f32.mrb[31].mxu0  ;;  %v3180_v40 = vsel %vm126_vm2, %v3176_v36, -inf }
 0xc3a   :  { %3181 = vmax.xlane.f32.xlu0 %v3180_v40 }
 0xc47   :  { %2517 = vrot.lane.b32.xlu1 %v4738_v50, %s4352_s11 }
 0xc50   :  { %2352 = vrot.lane.b32.xlu0 %v4738_v50, %s4353_s12 }
 0xcab   :  { %v2013_v42 = vpop.xlane.xlu0 %2012 }
 0xcac   :  { %v2014_v43 = vsub.f32 %v2007_v15, %v2013_v42  ;;  %v2178_v44 = vpop.xlane.xlu1 %2177 }
 0xcad   :  { %v2179_v13 = vsub.f32 %v2172_v19, %v2178_v44 }
 0xcae   :  { %v2015_v48 = vmul.f32 1.442695, %v2014_v43 }
 0xcaf   :  { %v2180_v49 = vmul.f32 1.442695, %v2179_v13 }
 0xcb0   :  { %4277 = vpow2.f32 %v2015_v48 }
 0xcb1   :  { %4279 = vpow2.f32 %v2180_v49 }
 0xcb3   :  { %v2343_v51 = vpop.xlane.xlu0 %2342 }
 0xcb4   :  { %v2344_v53 = vsub.f32 %v2337_v8, %v2343_v51 }
 0xcb6   :  { %v2345_v54 = vmul.f32 1.442695, %v2344_v53 }
 0xcb7   :  { %v2508_v55 = vpop.xlane.xlu0 %2507 }
 0xcb8   :  { %4281 = vpow2.f32 %v2345_v54  ;;  %v2509_v56 = vsub.f32 %v2502_v23, %v2508_v55 }
 0xcba   :  { %v4278_v57 = vpop.eup %4277  ;;  %v2510_v59 = vmul.f32 1.442695, %v2509_v56 }
 0xcbb   :  { %v4280_v58 = vpop.eup %4279  ;;  %v2017_v50 = vsel %vm126_vm2, %v4278_v57, 0.0  ;;  %v2687_v10 = vpop.xlane.xlu1 %2686 }
 0xcbc   :  { %4283 = vpow2.f32 %v2510_v59  ;;  %2018 = vadd.xlane.f32.xlu1 %v2017_v50  ;;  %v2182_v61 = vsel %vm126_vm2, %v4280_v58, 0.0  ;;  %v2688_v14 = vsub.f32 %v2681_v28, %v2687_v10 }
 0xcbd   :  { %2183 = vadd.xlane.f32.xlu0 %v2182_v61 }
 0xcbe   :  { %v2689_v20 = vmul.f32 1.442695, %v2688_v14 }
 0xcbf   :  { %v2852_v15 = vpop.xlane.xlu0 %2851 }
 0xcc0   :  { %v2853_v19 = vsub.f32 %v2846_v33, %v2852_v15  ;;  %4285 = vpow2.f32 %v2689_v20  ;;  %v4227_v15 = vpack.i.bf16 %v4695_v27, %v4690_v26 }
 0xcc2   :  { %v4282_v62 = vpop.eup %4281  ;;  %v2854_v8 = vmul.f32 1.442695, %v2853_v19 }
 0xcc3   :  { %v2347_v63 = vsel %vm126_vm2, %v4282_v62, 0.0  ;;  %v3017_v16 = vpop.xlane.xlu1 %3016 }
 0xcc4   :  { %2348 = vadd.xlane.f32.xlu1 %v2347_v63  ;;  %v3018_v17 = vsub.f32 %v3011_v2, %v3017_v16  ;;  %4287 = vpow2.f32 %v2854_v8  ;;  %v4232_v16 = vpack.i.bf16 %v4707_v30, %v4702_v29 }
 0xcc6   :  { %v4831_v4 = vpop.eup %4283  ;;  %v3019_v6 = vmul.f32 1.442695, %v3018_v17 }
 0xcc7   :  { %v2512_v7 = vsel %vm126_vm2, %v4831_v4, 0.0  ;;  %v3182_v21 = vpop.xlane.xlu0 %3181  ;;  %v2518_v2 = vpop.permute.xlu1 %2517 }
 0xcc8   :  { %2513 = vadd.xlane.f32.xlu0 %v2512_v7  ;;  %v3183_v22 = vsub.f32 %v3176_v36, %v3182_v21  ;;  %4289 = vpow2.f32 %v3019_v6 }
 0xcca   :  { %v3184_v23 = vmul.f32 1.442695, %v3183_v22  ;;  %v4286_v24 = vpop.eup %4285 }
 0xccb   :  { %v2691_v31 = vsel %vm126_vm2, %v4286_v24, 0.0  ;;  %v2353_v3 = vpop.permute.xlu0 %2352 }
 0xccc   :  { %4291 = vpow2.f32 %v3184_v23 }
 0xcce   :  { %v4839_v25 = vpop.eup %4287 }
 0xccf   :  { %v2856_v32 = vsel %vm126_vm2, %v4839_v25, 0.0 }
 0xcd2   :  { %v4842_v28 = vpop.eup %4289 }
 0xcd3   :  { %v3021_v33 = vsel %vm126_vm2, %v4842_v28, 0.0 }
 0xcd5   :  { %2861 = vrot.lane.b32.xlu1 %v4752_v12, %s4350_s9 }
 0xcd6   :  { %v4848_v0 = vpop.eup %4291 }
 0xcd7   :  { %v3186_v1 = vsel %vm126_vm2, %v4848_v0, 0.0 }
 0xcde   :  { %2696 = vrot.lane.b32.xlu0 %v4752_v12, %s4351_s10 }
 0xcf9   :  { %2692 = vadd.xlane.f32.xlu1 %v2691_v31 }
 0xcfd   :  { %2857 = vadd.xlane.f32.xlu0 %v2856_v32  ;;  %3022 = vadd.xlane.f32.xlu1 %v3021_v33 }
 0xd01   :  { %3187 = vadd.xlane.f32.xlu1 %v3186_v1 }
 0xd12   :  { %3191 = vrot.lane.b32.xlu1 %v4752_v12, %s4352_s11 }
 0xd13   :  { %3026 = vrot.lane.b32.xlu0 %v4752_v12, %s4353_s12 }
 0xd16   :  { %4233 = vrot.lane.b32.xlu1 %v4232_v16, %s4354_s13 }
 0xd17   :  { %4228 = vrot.lane.b32.xlu0 %v4227_v15, %s4354_s13 }
 0xd49   :  { %v2019_v35 = vpop.xlane.xlu1 %2018 }
 0xd4a   :  { %4293 = vrcp.f32 %v2019_v35  ;;  %v2184_v36 = vpop.xlane.xlu0 %2183 }
 0xd4b   :  { %4295 = vrcp.f32 %v2184_v36 }
 0xd51   :  { %v2349_v39 = vpop.xlane.xlu1 %2348 }
 0xd52   :  { %4297 = vrcp.f32 %v2349_v39 }
 0xd54   :  { %v4294_v40 = vpop.eup %4293 }
 0xd55   :  { %v2021_v42 = vmul.f32 %v4294_v40, %v4278_v57  ;;  %v2514_v43 = vpop.xlane.xlu0 %2513  ;;  %v4296_v44 = vpop.eup %4295 }
 0xd56   :  { %4299 = vrcp.f32 %v2514_v43  ;;  %v2186_v12 = vmul.f32 %v4296_v44, %v4280_v58  ;;  %v2862_v53 = vpop.permute.xlu1 %2861 }
 0xd57   :  { %4005 = vmatmul.mubr.msk.f32.vlgmr.msra.gmra.mrb[26].mxu1 %vm126_vm2, %v2021_v42 }
 0xd58   :  { %4013 = vmatpush3.msra.mxu1 %v4826_v41  ;;  %4014 = vmatprep.mubr.msk.f32.mxu1 %vm4342_vm1, %v4341_v9 }
 0xd59   :  { %4022 = vmatprep.subr.mxu1 %v4341_v9  ;;  %v2697_v51 = vpop.permute.xlu0 %2696 }
 0xd5b   :  { %4015 = vmatmul.mubr.msk.f32.vlgmr.msra.gmra.mrb[28].mxu1 %vm126_vm2, %v2186_v12 }
 0xd5c   :  { %v4298_v13 = vpop.eup %4297  ;;  %4023 = vmatpush3.msra.mxu1 %v2353_v3  ;;  %4024 = vmatprep.mubr.msk.f32.mxu1 %vm4342_vm1, %v4341_v9 }
 0xd5d   :  { %v2351_v48 = vmul.f32 %v4298_v13, %v4282_v62  ;;  %4032 = vmatprep.subr.mxu1 %v4341_v9 }
 0xd5f   :  { %4025 = vmatmul.mubr.msk.f32.vlgmr.msra.gmra.mrb[30].mxu1 %vm126_vm2, %v2351_v48 }
 0xd60   :  { %v4300_v49 = vpop.eup %4299  ;;  %4033 = vmatpush3.msra.mxu1 %v2518_v2  ;;  %4034 = vmatprep.mubr.msk.f32.mxu1 %vm4342_vm1, %v4341_v9 }
 0xd61   :  { %v2516_v41 = vmul.f32 %v4300_v49, %v4831_v4  ;;  %4042 = vmatprep.subr.mxu1 %v4341_v9 }
 0xd63   :  { %4035 = vmatmul.mubr.msk.f32.vlgmr.msra.gmra.mrb[32].mxu1 %vm126_vm2, %v2516_v41 }
 0xd64   :  { %4043 = vmatpush3.msra.mxu1 %v2697_v51  ;;  %4044 = vmatprep.mubr.msk.f32.mxu1 %vm4342_vm1, %v4341_v9 }
 0xd65   :  { %4052 = vmatprep.subr.mxu1 %v4341_v9 }
 0xd86   :  { %v2693_v54 = vpop.xlane.xlu1 %2692 }
 0xd87   :  { %4301 = vrcp.f32 %v2693_v54 }
 0xd8a   :  { %v2858_v55 = vpop.xlane.xlu0 %2857  ;;  %v3023_v56 = vpop.xlane.xlu1 %3022 }
 0xd8b   :  { %4303 = vrcp.f32 %v2858_v55 }
 0xd8c   :  { %4305 = vrcp.f32 %v3023_v56 }
 0xd8e   :  { %v3188_v57 = vpop.xlane.xlu1 %3187  ;;  %v3027_v63 = vpop.permute.xlu0 %3026 }
 0xd8f   :  { %4307 = vrcp.f32 %v3188_v57 }
 0xd91   :  { %v4302_v59 = vpop.eup %4301 }
 0xd92   :  { %v2695_v58 = vmul.f32 %v4302_v59, %v4286_v24  ;;  %v3192_v10 = vpop.permute.xlu1 %3191  ;;  %v4229_v19 = vpop.permute.xlu0 %4228 }
 0xd93   :  { %v4231_v20 = vunpack.i.h.bf16 %v4229_v19  ;;  %v4230_v17 = vunpack.i.l.bf16 %v4229_v19  ;;  %v3688_v19 = vld [vmem:[%s4996_s1 + $0x58] sm:$0xff] }
 0xd94   :  { %4045 = vmatmul.mubr.msk.f32.vlgmr.msra.gmra.mrb[34].mxu1 %vm126_vm2, %v2695_v58 }
 0xd95   :  { %v4304_v50 = vpop.eup %4303  ;;  %4053 = vmatpush3.msra.mxu1 %v2862_v53  ;;  %4054 = vmatprep.mubr.msk.f32.mxu1 %vm4342_vm1, %v4341_v9  ;;  %v4166_v21 = vpack.c.bf16 %v4231_v20, %v4230_v17  ;;  %v3285_v53 = vrot.slane %v4733_v47, %v1476_v18  ;;  %v3690_v17 = vld [vmem:[%s4996_s1 + $0x68] sm:$0xff] }
 0xd96   :  { %v2860_v61 = vmul.f32 %v4304_v50, %v4839_v25  ;;  %4062 = vmatprep.subr.mxu1 %v4341_v9  ;;  %v4306_v62 = vpop.eup %4305  ;;  %v4234_v8 = vpop.permute.xlu1 %4233 }
 0xd97   :  { %v3025_v4 = vmul.f32 %v4306_v62, %v4842_v28  ;;  %v4235_v6 = vunpack.i.l.bf16 %v4234_v8  ;;  %4167 = vmatprep.subr.bf16.mxu0 %v4166_v21 }
 0xd98   :  { %4055 = vmatmul.mubr.msk.f32.vlgmr.msra.gmra.mrb[36].mxu1 %vm126_vm2, %v2860_v61  ;;  %4169 = vmatpush3.bf16.msra.mxu0 %v4166_v21  ;;  %v3692_v21 = vld [vmem:[%s4996_s1 + $0x78] sm:$0xff] }
 0xd99   :  { %4063 = vmatpush3.msra.mxu1 %v3027_v63  ;;  %4064 = vmatprep.mubr.msk.f32.mxu1 %vm4342_vm1, %v4341_v9  ;;  %v4308_v7 = vpop.eup %4307 }
 0xd9a   :  { %4072 = vmatprep.subr.mxu1 %v4341_v9  ;;  %v3190_v14 = vmul.f32 %v4308_v7, %v4848_v0 }
 0xd9c   :  { %4065 = vmatmul.mubr.msk.f32.vlgmr.msra.gmra.mrb[38].mxu1 %vm126_vm2, %v3025_v4 }
 0xd9d   :  { %4073 = vmatpush3.msra.mxu1 %v3192_v10  ;;  %4074 = vmatprep.mubr.msk.f32.mxu1 %vm4342_vm1, %v4341_v9  ;;  %v4236_v9 = vunpack.i.h.bf16 %v4234_v8  ;;  %v4178_v8 = vpack.c.bf16 %v3692_v21, %v3690_v17 }
 0xd9f   :  { %v4170_v22 = vpack.c.bf16 %v4236_v9, %v4235_v6  ;;  %v3693_v9 = vld [vmem:[%s4997_s2 + $0x40] sm:$0xff]  ;;  %v3694_v6 = vld [vmem:[%s4997_s2 + $0x48] sm:$0xff] }
 0xda0   :  { %4075 = vmatmul.mubr.msk.f32.vlgmr.msra.gmra.mrb[40].mxu1 %vm126_vm2, %v3190_v14 }
 0xda1   :  { %4171 = vmatprep.subr.bf16.mxu0 %v4170_v22 }
 0xda2   :  { %4173 = vmatpush3.bf16.msra.mxu0 %v4170_v22  ;;  %v3695_v22 = vld [vmem:[%s4997_s2 + $0x50] sm:$0xff] }
 0xe2a   :  { %v2094_v26 = vpop.f32.mrb[26].mxu1 }
 0xe2b   :  { %v4006_v27 = vpop.f32.mrb[27].mxu1 }
 0xe2c   :  { %v3696_v27 = vld [vmem:[%s4997_s2 + $0x58] sm:$0xff] }
 0xe2e   :  { %v2259_v23 = vpop.f32.mrb[28].mxu1 }
 0xe2f   :  { %2594 = vrot.lane.b32.xlu0 %v2259_v23, %s4355_s14  ;;  %v4016_v29 = vpop.f32.mrb[29].mxu1  ;;  %v4186_v23 = vpack.c.bf16 %v3696_v27, %v3695_v22  ;;  %v3632_v27 = vrot.slane %v4733_v47, %v1825_v34 }
 0xe30   :  { %v3697_v29 = vld [vmem:[%s4997_s2 + $0x60] sm:$0xff] }
 0xe32   :  { %v2424_v30 = vpop.f32.mrb[30].mxu1 }
 0xe33   :  { %2598 = vrot.lane.b32.xlu1 %v2424_v30, %s4356_s15  ;;  %v4026_v24 = vpop.f32.mrb[31].mxu1  ;;  %v3698_v30 = vld [vmem:[%s4997_s2 + $0x68] sm:$0xff] }
 0xe34   :  { %v4190_v24 = vpack.c.bf16 %v3698_v30, %v3697_v29 }
 0xe36   :  { %v2589_v25 = vpop.f32.mrb[32].mxu1 }
 0xe37   :  { %2602 = vrot.lane.b32.xlu1 %v2589_v25, %s4357_s16  ;;  %v4036_v31 = vpop.f32.mrb[33].mxu1 }
 0xe67   :  { %v2768_v28 = vpop.f32.mrb[34].mxu1 }
 0xe68   :  { %v4046_v32 = vpop.f32.mrb[35].mxu1 }
 0xe6b   :  { %v2933_v33 = vpop.f32.mrb[36].mxu1 }
 0xe6c   :  { %3268 = vrot.lane.b32.xlu0 %v2933_v33, %s4355_s14  ;;  %v4056_v0 = vpop.f32.mrb[37].mxu1 }
 0xe6f   :  { %v3098_v1 = vpop.f32.mrb[38].mxu1 }
 0xe70   :  { %3272 = vrot.lane.b32.xlu0 %v3098_v1, %s4356_s15  ;;  %v4066_v2 = vpop.f32.mrb[39].mxu1  ;;  %v3414_v1 = vrot.slane %v4733_v47, %v1606_v37  ;;  %v3699_v37 = vld [vmem:[%s4997_s2 + $0x70] sm:$0xff] }
 0xe73   :  { %v3263_v3 = vpop.f32.mrb[40].mxu1 }
 0xe74   :  { %3276 = vrot.lane.b32.xlu1 %v3263_v3, %s4357_s16  ;;  %v4076_v35 = vpop.f32.mrb[41].mxu1 }
 0xe75   :  { %v3420_v35 = vrot.slane %v4733_v47, %v1612_v38  ;;  %v3426_v38 = vrot.slane %v4733_v47, %v1618_v52 }
 0xea1   :  { %v2595_v36 = vpop.permute.xlu0 %2594 }
 0xea2   :  { %v2605_v40 = vsel %vm126_vm2, %v2094_v26, %v2595_v36  ;;  %v4182_v26 = vpack.c.bf16 %v3694_v6, %v3693_v9  ;;  %v3626_v9 = vrot.slane %v4733_v47, %v1819_v5 }
 0xea4   :  { %4183 = vmatprep.subr.bf16.mxu0 %v4182_v26 }
 0xea5   :  { %v2599_v39 = vpop.permute.xlu1 %2598 }
 0xea6   :  { %v2606_v42 = vsel %vm796_vm3, %v2605_v40, %v2599_v39 }
 0xea9   :  { %v2603_v43 = vpop.permute.xlu1 %2602 }
 0xeaa   :  { %v2607_v44 = vsel %vm798_vm4, %v2606_v42, %v2603_v43 }
 0xeab   :  { %4085 = vmatprep.mubr.msk.f32.mxu0 %vm41_vm0, %v2607_v44 }
 0xede   :  { %v3269_v12 = vpop.permute.xlu0 %3268 }
 0xedf   :  { %v3279_v48 = vsel %vm126_vm2, %v2768_v28, %v3269_v12  ;;  %v3700_v12 = vld [vmem:[%s4997_s2 + $0x78] sm:$0xff]  ;;  %s4358_s2 = smov [#allocation2]  }
 0xee0   :  { %s3642_s23 = sshll.u32 %s4358_s2, 4  ;;  %s3643_s23 = int_to_ptr.vmem [resolvable:$true] %s3642_s23 }
 0xee1   :  { %s4317_s24 = scalar_lea.vmem %s3643_s23, 256  ;;  %p4322_p1 = scmp.lt.s32.totalorder %s3643_s23, %s3643_s23 }
 0xee2   :  { %v3273_v13 = vpop.permute.xlu0 %3272  ;;  %p4318_p0 = scmp.ne.s32.totalorder %s3643_s23, %s4317_s24  ;;  %p4323_p2 = scmp.lt.s32.totalorder %s4317_s24, %s4317_s24 }
 0xee3   :  { %v3280_v49 = vsel %vm796_vm3, %v3279_v48, %v3273_v13  ;;  %v4194_v13 = vpack.c.bf16 %v3700_v12, %v3699_v37 }
 0xee4   :  { %p4324_p3 = por %p4323_p2, %p4322_p1 }
 0xee6   :  { %v3277_v41 = vpop.permute.xlu1 %3276  ;;  %p4325_p4 = pnand %p4324_p3, %p4318_p0 }
 0xee7   :  { %v3281_v51 = vsel %vm798_vm4, %v3280_v49, %v3277_v41 }
 0xee8   :  { %4086 = vmatmul.mubr.msk.f32.vlgmr.msra.gmra.mrb[32].mxu0 %vm41_vm0, %v3281_v51 }
 0xee9   :  { %4185 = vmatpush3.bf16.msra.mxu0 %v4182_v26 }
 0xeea   :  { %4187 = vmatprep.subr.bf16.mxu0 %v4186_v23 }
 0xeed   :  { %4189 = vmatpush3.bf16.msra.mxu0 %v4186_v23 }
 0xeee   :  { %4191 = vmatprep.subr.bf16.mxu0 %v4190_v24 }
 0xef1   :  { %4193 = vmatpush3.bf16.msra.mxu0 %v4190_v24 }
 0xef2   :  { %4195 = vmatprep.subr.bf16.mxu0 %v4194_v13 }
 0xef5   :  { %4197 = vmatpush3.bf16.msra.mxu0 %v4194_v13 }
 0xfbb   :  { %v4087_v54 = vpop.f32.mrb[32].mxu0 }
 0xfbc   :  { %v3380_v55 = vadd.f32 %v4087_v54, %v3285_v53  ;;  %v3374_v56 = vpop.f32.mrb[33].mxu0 }
 0xfbd   :  { %v3375_v57 = vadd.f32 %v3374_v56, %v3285_v53 }
 0xfbe   :  { %v3384_v59 = vadd.f32 %v3380_v55, %v4722_v46  ;;  %v3513_v55 = vrot.slane %v4733_v47, %v1705_v60 }
 0xfbf   :  { %v3383_v58 = vadd.f32 %v3375_v57, %v4720_v45  ;;  %v3686_v45 = vld [vmem:[%s4996_s1 + $0x48] sm:$0xff] }
 0xfc0   :  { %v3388_v50 = vsel %vm41_vm0, %v3384_v59, 0.0  ;;  %v4174_v20 = vpack.c.bf16 %v3688_v19, %v3686_v45 }
 0xfc1   :  { %3389 = vadd.xlane.f32.xlu1 %v3388_v50  ;;  %v3385_v61 = vsel %vm41_vm0, %v3383_v58, 0.0 }
 0xfc2   :  { %3386 = vadd.xlane.f32.xlu0 %v3385_v61  ;;  %4175 = vmatprep.subr.bf16.mxu1 %v4174_v20 }
 0xfc3   :  { %4177 = vmatpush3.bf16.msra.mxu1 %v4174_v20 }
 0xfc4   :  { %4179 = vmatprep.subr.bf16.mxu1 %v4178_v8 }
 0xfc7   :  { %4181 = vmatpush3.bf16.msra.mxu1 %v4178_v8 }
0x104e   :  { %v3390_v62 = vpop.xlane.xlu1 %3389 }
0x104f   :  { %v3392_v63 = vmul.f32 0.03125, %v3390_v62  ;;  %v3387_v4 = vpop.xlane.xlu0 %3386 }
0x1050   :  { %v3391_v7 = vmul.f32 0.03125, %v3387_v4 }
0x1051   :  { %v3394_v10 = vsub.f32 %v3384_v59, %v3392_v63 }
0x1052   :  { %v3393_v18 = vsub.f32 %v3383_v58, %v3391_v7 }
0x1053   :  { %v3396_v16 = vmul.f32 %v3394_v10, %v3394_v10 }
0x1054   :  { %v3395_v14 = vmul.f32 %v3393_v18, %v3393_v18 }
0x1055   :  { %v3400_v46 = vsel %vm41_vm0, %v3396_v16, 0.0 }
0x1056   :  { %v3397_v15 = vsel %vm41_vm0, %v3395_v14, 0.0 }
0x1057   :  { %3398 = vadd.xlane.f32.xlu0 %v3397_v15 }
0x105b   :  { %3401 = vadd.xlane.f32.xlu0 %v3400_v46 }
0x10e4   :  { %v3399_v25 = vpop.xlane.xlu0 %3398 }
0x10e5   :  { %v3403_v31 = vmul.f32 0.03125, %v3399_v25 }
0x10e7   :  { %v3405_v28 = vadd.f32 1e-05, %v3403_v31 }
0x10e8   :  { %v3402_v32 = vpop.xlane.xlu0 %3401 }
0x10e9   :  { %4309 = vrsqrt.f32 %v3405_v28  ;;  %v3404_v33 = vmul.f32 0.03125, %v3402_v32 }
0x10eb   :  { %v3406_v0 = vadd.f32 1e-05, %v3404_v33 }
0x10ed   :  { %4311 = vrsqrt.f32 %v3406_v0 }
0x10f3   :  { %v4310_v2 = vpop.eup %4309 }
0x10f4   :  { %v3409_v3 = vmul.f32 %v4310_v2, %v3393_v18 }
0x10f6   :  { %v3415_v36 = vmul.f32 %v3414_v1, %v3409_v3 }
0x10f7   :  { %v4312_v39 = vpop.eup %4311 }
0x10f8   :  { %v3410_v40 = vmul.f32 %v4312_v39, %v3394_v10  ;;  %v3421_v42 = vadd.f32 %v3420_v35, %v3415_v36 }
0x10fa   :  { %v3416_v43 = vmul.f32 %v3414_v1, %v3410_v40  ;;  %4096 = vmatprep.mubr.msk.f32.mxu1 %vm41_vm0, %v3421_v42 }
0x10fc   :  { %v3422_v44 = vadd.f32 %v3420_v35, %v3416_v43 }
0x10fe   :  { %4097 = vmatmul.mubr.msk.f32.vlgmr.msra.gmra.mrb[42].mxu1 %vm41_vm0, %v3422_v44 }
0x11d1   :  { %v4098_v48 = vpop.f32.mrb[42].mxu1 }
0x11d2   :  { %v3505_v49 = vadd.f32 %v4098_v48, %v3426_v38  ;;  %v3499_v41 = vpop.f32.mrb[43].mxu1 }
0x11d3   :  { %v3500_v51 = vadd.f32 %v3499_v41, %v3426_v38 }
0x11d4   :  { %v3509_v54 = vmax.f32 %v3505_v49, 0.0 }
0x11d5   :  { %v3508_v53 = vmax.f32 %v3500_v51, 0.0 }
0x11d7   :  { %4115 = vmatprep.mubr.msk.f32.mxu0 %vm1707_vm5, %v3508_v53 }
0x11d8   :  { %4116 = vmatmul.mubr.msk.f32.vlgmr.msra.gmra.mrb[34].mxu0 %vm1707_vm5, %v3509_v54 }
0x12ab   :  { %v4117_v56 = vpop.f32.mrb[34].mxu0 }
0x12ac   :  { %v3592_v57 = vadd.f32 %v4117_v56, %v3513_v55  ;;  %v3586_v59 = vpop.f32.mrb[35].mxu0 }
0x12ad   :  { %v3587_v58 = vadd.f32 %v3586_v59, %v3513_v55 }
0x12ae   :  { %v3596_v50 = vadd.f32 %v3592_v57, %v3422_v44 }
0x12af   :  { %v3595_v52 = vadd.f32 %v3587_v58, %v3421_v42 }
0x12b0   :  { %v3600_v61 = vsel %vm41_vm0, %v3596_v50, 0.0 }
0x12b1   :  { %3601 = vadd.xlane.f32.xlu0 %v3600_v61  ;;  %v3597_v62 = vsel %vm41_vm0, %v3595_v52, 0.0 }
0x12b2   :  { %3598 = vadd.xlane.f32.xlu1 %v3597_v62 }
0x133e   :  { %v3602_v63 = vpop.xlane.xlu0 %3601 }
0x133f   :  { %v3604_v4 = vmul.f32 0.03125, %v3602_v63  ;;  %v3599_v7 = vpop.xlane.xlu1 %3598 }
0x1340   :  { %v3603_v10 = vmul.f32 0.03125, %v3599_v7 }
0x1341   :  { %v3606_v18 = vsub.f32 %v3596_v50, %v3604_v4 }
0x1342   :  { %v3605_v14 = vsub.f32 %v3595_v52, %v3603_v10 }
0x1343   :  { %v3608_v15 = vmul.f32 %v3606_v18, %v3606_v18 }
0x1344   :  { %v3607_v60 = vmul.f32 %v3605_v14, %v3605_v14 }
0x1345   :  { %v3612_v16 = vsel %vm41_vm0, %v3608_v15, 0.0 }
0x1346   :  { %3613 = vadd.xlane.f32.xlu0 %v3612_v16  ;;  %v3609_v46 = vsel %vm41_vm0, %v3607_v60, 0.0 }
0x1347   :  { %3610 = vadd.xlane.f32.xlu1 %v3609_v46 }
0x13d3   :  { %v3614_v45 = vpop.xlane.xlu0 %3613 }
0x13d4   :  { %v3616_v19 = vmul.f32 0.03125, %v3614_v45  ;;  %v3611_v20 = vpop.xlane.xlu1 %3610 }
0x13d5   :  { %v3615_v17 = vmul.f32 0.03125, %v3611_v20 }
0x13d6   :  { %v3618_v21 = vadd.f32 1e-05, %v3616_v19 }
0x13d7   :  { %v3617_v8 = vadd.f32 1e-05, %v3615_v17 }
0x13d8   :  { %4313 = vrsqrt.f32 %v3618_v21 }
0x13d9   :  { %4315 = vrsqrt.f32 %v3617_v8 }
0x13e2   :  { %v4314_v6 = vpop.eup %4313 }
0x13e3   :  { %v4316_v22 = vpop.eup %4315  ;;  %v3622_v26 = vmul.f32 %v4314_v6, %v3606_v18 }
0x13e4   :  { %v3621_v23 = vmul.f32 %v4316_v22, %v3605_v14 }
0x13e5   :  { %v3628_v29 = vmul.f32 %v3626_v9, %v3622_v26 }
0x13e6   :  { %v3627_v30 = vmul.f32 %v3626_v9, %v3621_v23 }
0x13e7   :  { %v3634_v24 = vadd.f32 %v3632_v27, %v3628_v29 }
0x13e8   :  { %v3633_v25 = vadd.f32 %v3632_v27, %v3627_v30 }
0x13e9   :  { %3636 = vst.msk [vmem:[#allocation2 + $0x8] sm:$0xff] %vm41_vm0, %v3634_v24 }
0x13ea   :  { %3635 = vst.msk [vmem:[#allocation2] sm:$0xff] %vm41_vm0, %v3633_v25 }
0x13eb   :  { %4328 = shalt.err (!%p4325_p4)
}
0x13ec   :  { %s4329_s3 = scalar_lea.hbm %s4999_s4, 256 }
0x13ed   :  { %p4330_p5 = scmp.ne.s32.totalorder %s4999_s4, %s4329_s3  ;;  %p4333_p6 = scmp.lt.u32.totalorder %s4329_s3, %s4999_s4 }
0x13ef   :  { %p4335_p7 = pnand %p4333_p6, %p4330_p5 }
0x13f1   :  { %4338 = shalt.err (!%p4335_p7)
}
0x13f2   :  { %s4359_s6 = smov 128  }
0x13f3   :  { %3648 = dma.vmem_to_hbm [thread:$0]  %s3643_s23, 256, %s4999_s4, [#allocation3], %s4359_s6, %s4359_s6, %s4355_s14  }
0x13f4   :  { %4339 = dma.done.wait [#allocation3], 256  }
0x13f5   :  { %4340 = vsyncadd [#allocation3], 4294967040 }
0x13f6   :  { %3652 = vsyncpa [#allocation3], 1 }

</bundles_post_ra>
